<compile_context>
chip_gen: v6e
topology: v6e:2x2x1
jax: 0.10.0
libtpu: 0.0.40
codegen_flags: <defaults>
</compile_context>

<pallas_src>
import functools

import jax
import jax.numpy as jnp
from jax import lax
from jax.experimental import pallas as pl
from jax.experimental.pallas import tpu as pltpu


def _round_up(x, m):
    return (x + m - 1) // m * m


# ------------------------------- Pallas kernel -------------------------------
def _mask_head_kernel(x_ref, ml_ref, mr_ref,
                      w1_ref, b1_ref, w2_ref, b2_ref, w3_ref, b3_ref,
                      w5_ref, b5_ref, wl_ref, bl_ref,
                      o_ref, h1_ref, h2_ref, *, H, W, pad_top):
    """One image per grid step.

    x_ref : (R, Cin) f32  zero-row-padded flat image, R = pad_top + H*W + pad_bot
    ml/mr : (H*W, 1) f32  column-validity masks for dx = -1 / +1 taps
    w{1,2,3}: (9, Cin, C) bf16 3x3 weights, tap k = (dy+1)*3 + (dx+1)
    b{1,2,3}: (1, C) f32
    w5    : (C, 4*C) bf16 deconv weight, columns ordered (u, v, o)
    b5    : (1, 4*C) f32  (b5 tiled over the 4 sub-pixels)
    wl    : (4*C, 4) bf16 block-diagonal 1x1-conv projection;  bl: (1, 4) f32
    o_ref : (1, H*W, 4) f32 logits; column j = u*2 + v is pixel (2h+u, 2w+v)
    h1/h2 : (R, C) f32 VMEM scratch holding padded intermediate activations
    """
    M = H * W
    ml = ml_ref[...]
    mr = mr_ref[...]

    def conv3x3_relu(load, w_ref, b_ref):
        cout = w_ref.shape[-1]
        acc = jnp.zeros((M, cout), jnp.float32)
        for k in range(9):                       # unrolled: 9 shifted matmuls
            dy, dx = k // 3 - 1, k % 3 - 1
            lhs = load(pad_top + dy * W + dx)    # (M, Cin) f32, static offset
            if dx == -1:
                lhs = lhs * ml                   # kill left-edge wrap-around
            elif dx == 1:
                lhs = lhs * mr                   # kill right-edge wrap-around
            acc = acc + jnp.dot(lhs.astype(jnp.bfloat16), w_ref[k],
                                preferred_element_type=jnp.float32)
        return jnp.maximum(acc + b_ref[...], 0.0)          # (M, cout) f32

    def store_padded(h_ref, val):
        # Body rows go to [pad_top, pad_top + M); halo rows stay zero so the
        # next layer's shifted-row loads see the conv's zero padding.
        h_ref[...] = jnp.zeros_like(h_ref)
        h_ref[pl.ds(pad_top, M), :] = val

    y = conv3x3_relu(lambda off: x_ref[pl.ds(off, M), :], w1_ref, b1_ref)
    store_padded(h1_ref, y)
    y = conv3x3_relu(lambda off: h1_ref[pl.ds(off, M), :], w2_ref, b2_ref)
    store_padded(h2_ref, y)
    y = conv3x3_relu(lambda off: h2_ref[pl.ds(off, M), :], w3_ref, b3_ref)

    # Deconv 2x2 / stride 2 (+ bias + ReLU) fused with the final 1x1 conv.
    z = jnp.dot(y.astype(jnp.bfloat16), w5_ref[...],
                preferred_element_type=jnp.float32)                  # (M, 4C)
    z = jnp.maximum(z + b5_ref[...], 0.0)
    out4 = jnp.dot(z.astype(jnp.bfloat16), wl_ref[...],
                   preferred_element_type=jnp.float32) + bl_ref[...]  # (M, 4)
    o_ref[...] = out4[None].astype(o_ref.dtype)


# --------------------------------- wrapper ------------------------------------
def roi_align_mask_head_forward(x_nchw, params):
    Nb, Cin, H, W = x_nchw.shape
    C = params["w1"].shape[0]
    M = H * W
    pad_top = _round_up(W + 1, 8)                     # >= W+1, sublane aligned
    R = _round_up(pad_top + M + W + 1, 8)             # total padded rows
    pad_bot = R - pad_top - M                         # >= W+1

    # ---- host-side layout prep (small, one-off XLA glue) ----
    x_flat = jnp.transpose(x_nchw, (0, 2, 3, 1)).reshape(Nb, M, Cin)
    x_pad = jnp.pad(x_flat.astype(jnp.float32),
                    ((0, 0), (pad_top, pad_bot), (0, 0))).reshape(Nb * R, Cin)

    col = jnp.arange(M, dtype=jnp.int32) % W
    ml = (col > 0).astype(jnp.float32).reshape(M, 1)          # dx = -1 valid
    mr = (col < W - 1).astype(jnp.float32).reshape(M, 1)      # dx = +1 valid

    def prep3x3(w):   # (Cout, Cin, 3, 3) -> (9, Cin, Cout) bf16, tap=(kh,kw)
        return jnp.transpose(w, (2, 3, 1, 0)).reshape(
            9, w.shape[1], w.shape[0]).astype(jnp.bfloat16)

    w1 = prep3x3(params["w1"]); b1 = params["b1"].reshape(1, C).astype(jnp.float32)
    w2 = prep3x3(params["w2"]); b2 = params["b2"].reshape(1, C).astype(jnp.float32)
    w3 = prep3x3(params["w3"]); b3 = params["b3"].reshape(1, C).astype(jnp.float32)

    # deconv weight (Cin, Cout, 2, 2) -> (Cin, 4*Cout), columns ordered (u, v, o)
    w5 = jnp.transpose(params["w5"], (0, 2, 3, 1)).reshape(C, 4 * C).astype(jnp.bfloat16)
    b5 = jnp.tile(params["b5"], 4).reshape(1, 4 * C).astype(jnp.float32)

    # final 1x1 conv folded into a (4C, 4) block-diagonal projection
    wl_vec = params["wl"].reshape(-1).astype(jnp.float32)                 # (C,)
    wl_blk = jnp.kron(jnp.eye(4, dtype=jnp.float32),
                      wl_vec[:, None]).astype(jnp.bfloat16)               # (4C, 4)
    bl4 = jnp.tile(params["bl"].reshape(1, 1), (1, 4)).astype(jnp.float32)

    conv_flops = 3 * 2 * M * (9 * Cin) * C
    deconv_flops = 2 * M * C * (4 * C) + 2 * M * (4 * C) * 4
    flops = Nb * (conv_flops + deconv_flops)
    bytes_accessed = int(
        x_pad.size * 4 + Nb * M * 4 * 4
        + (w1.size + w2.size + w3.size + w5.size + wl_blk.size) * 2
        + (b1.size + b2.size + b3.size + b5.size + bl4.size + 2 * M) * 4)

    out4 = pl.pallas_call(
        functools.partial(_mask_head_kernel, H=H, W=W, pad_top=pad_top),
        out_shape=jax.ShapeDtypeStruct((Nb, M, 4), jnp.float32),
        grid=(Nb,),
        in_specs=[
            pl.BlockSpec((R, Cin), lambda i: (i, 0)),           # x (per image)
            pl.BlockSpec((M, 1), lambda i: (0, 0)),             # ml
            pl.BlockSpec((M, 1), lambda i: (0, 0)),             # mr
            pl.BlockSpec((9, Cin, C), lambda i: (0, 0, 0)),     # w1 (resident)
            pl.BlockSpec((1, C), lambda i: (0, 0)),             # b1
            pl.BlockSpec((9, C, C), lambda i: (0, 0, 0)),       # w2
            pl.BlockSpec((1, C), lambda i: (0, 0)),             # b2
            pl.BlockSpec((9, C, C), lambda i: (0, 0, 0)),       # w3
            pl.BlockSpec((1, C), lambda i: (0, 0)),             # b3
            pl.BlockSpec((C, 4 * C), lambda i: (0, 0)),         # w5
            pl.BlockSpec((1, 4 * C), lambda i: (0, 0)),         # b5 (tiled)
            pl.BlockSpec((4 * C, 4), lambda i: (0, 0)),         # wl block-diag
            pl.BlockSpec((1, 4), lambda i: (0, 0)),             # bl
        ],
        out_specs=pl.BlockSpec((1, M, 4), lambda i: (i, 0, 0)),
        scratch_shapes=[pltpu.VMEM((R, C), jnp.float32),
                        pltpu.VMEM((R, C), jnp.float32)],
        compiler_params=pltpu.CompilerParams(
            dimension_semantics=("parallel",)),      # v7x: split ROIs over TCs
        cost_estimate=pl.CostEstimate(flops=flops, transcendentals=0,
                                      bytes_accessed=bytes_accessed),
    )(x_pad, ml, mr, w1, b1, w2, b2, w3, b3, w5, b5, wl_blk, bl4)

    # (Nb, H*W, 4) -> (Nb, 1, 2H, 2W): tiny 1-channel 2x2 sub-pixel interleave.
    y = out4.reshape(Nb, H, W, 2, 2)
    y = jnp.transpose(y, (0, 1, 3, 2, 4)).reshape(Nb, 2 * H, 2 * W)
    return y[:, None, :, :]


# ----------------------------- pure-JAX reference -----------------------------
def ref_forward(x_nchw, params):
    """XLA reference with the same bf16-input / f32-accumulate arithmetic."""
    bf16, f32 = jnp.bfloat16, jnp.float32
    x = jnp.transpose(x_nchw, (0, 2, 3, 1)).astype(f32)

    def conv3(x, w, b):
        w_hwio = jnp.transpose(w, (2, 3, 1, 0)).astype(bf16)
        y = lax.conv_general_dilated(
            x.astype(bf16), w_hwio, window_strides=(1, 1), padding="SAME",
            dimension_numbers=("NHWC", "HWIO", "NHWC"),
            preferred_element_type=f32)
        return jax.nn.relu(y + b)

    x = conv3(x, params["w1"], params["b1"])
    x = conv3(x, params["w2"], params["b2"])
    x = conv3(x, params["w3"], params["b3"])

    Nb, H, W, C = x.shape
    w5 = params["w5"].astype(bf16)
    y = jnp.einsum("nhwi,iouv->nhuwvo", x.astype(bf16), w5,
                   preferred_element_type=f32).reshape(Nb, 2 * H, 2 * W, C)
    x = jax.nn.relu(y + params["b5"])

    wl = params["wl"].reshape(-1).astype(bf16)
    y = jnp.einsum("nhwc,c->nhw", x.astype(bf16), wl,
                   preferred_element_type=f32) + params["bl"][0]
    return y[:, None, :, :]


# ---------------------------------- params ------------------------------------
def init_params(key, channels):
    """Kaiming-normal-ish (fan_out, relu) weights.  PyTorch inits biases to 0;
    small random biases are used here only to exercise the bias path."""
    C = channels
    ks = jax.random.split(key, 10)

    def kaiming(k, shape, fan_out):
        return (2.0 / fan_out) ** 0.5 * jax.random.normal(k, shape, jnp.float32)

    def small(k, shape):
        return 0.1 * jax.random.normal(k, shape, jnp.float32)

    return {
        # Conv2d weights: (Cout, Cin, kH, kW); ConvTranspose2d: (Cin, Cout, kH, kW)
        "w1": kaiming(ks[0], (C, C, 3, 3), C * 9), "b1": small(ks[5], (C,)),
        "w2": kaiming(ks[1], (C, C, 3, 3), C * 9), "b2": small(ks[6], (C,)),
        "w3": kaiming(ks[2], (C, C, 3, 3), C * 9), "b3": small(ks[7], (C,)),
        "w5": kaiming(ks[3], (C, C, 2, 2), C * 4), "b5": small(ks[8], (C,)),
        "wl": kaiming(ks[4], (1, C, 1, 1), 1),     "bl": small(ks[9], (1,)),
    }


# ------------------------------------ main -------------------------------------
if __name__ == "__main__":
    # Small shapes standing in for the 256-channel / 14x14 RoI mask head.
    N, C, H, W = 2, 32, 8, 8
    key = jax.random.PRNGKey(0)
    k_x, k_p = jax.random.split(key)
    x = jax.random.normal(k_x, (N, C, H, W), dtype=jnp.float32)
    params = init_params(k_p, C)

    out = jax.block_until_ready(jax.jit(roi_align_mask_head_forward)(x, params))
    ref = jax.block_until_ready(jax.jit(ref_forward)(x, params))

    assert out.shape == (N, 1, 2 * H, 2 * W), out.shape
    max_err = float(jnp.max(jnp.abs(out - ref)))
    assert jnp.allclose(out, ref, rtol=1e-2, atol=1e-2), max_err
    print("KERNEL_OK")
</pallas_src>

<mosaic_0001>
module attributes {stable_mosaic.version = 11 : i64} {
  func.func @_mask_head_kernel(%arg0: i32, %arg1: memref<96x32xf32, #tpu.memory_space<vmem>>, %arg2: memref<64x1xf32, #tpu.memory_space<vmem>>, %arg3: memref<64x1xf32, #tpu.memory_space<vmem>>, %arg4: memref<9x32x32xbf16, #tpu.memory_space<vmem>>, %arg5: memref<1x32xf32, #tpu.memory_space<vmem>>, %arg6: memref<9x32x32xbf16, #tpu.memory_space<vmem>>, %arg7: memref<1x32xf32, #tpu.memory_space<vmem>>, %arg8: memref<9x32x32xbf16, #tpu.memory_space<vmem>>, %arg9: memref<1x32xf32, #tpu.memory_space<vmem>>, %arg10: memref<32x128xbf16, #tpu.memory_space<vmem>>, %arg11: memref<1x128xf32, #tpu.memory_space<vmem>>, %arg12: memref<128x4xbf16, #tpu.memory_space<vmem>>, %arg13: memref<1x4xf32, #tpu.memory_space<vmem>>, %arg14: memref<1x64x4xf32, #tpu.memory_space<vmem>>, %arg15: memref<96x32xf32, #tpu.memory_space<vmem>>, %arg16: memref<96x32xf32, #tpu.memory_space<vmem>>) attributes {dimension_semantics = [#tpu.dimension_semantics<parallel>], iteration_bounds = array<i64: 2>, scalar_prefetch = 0 : i64, scratch_operands = 2 : i64, tpu.core_type = #tpu.core_type<tc>, window_params = [{transform_indices = @transform_0, window_bounds = array<i64: 96, 32>}, {pipeline_mode = #tpu.pipeline_mode<synchronous>, transform_indices = @transform_1, window_bounds = array<i64: 64, 1>}, {pipeline_mode = #tpu.pipeline_mode<synchronous>, transform_indices = @transform_2, window_bounds = array<i64: 64, 1>}, {pipeline_mode = #tpu.pipeline_mode<synchronous>, transform_indices = @transform_3, window_bounds = array<i64: 9, 32, 32>}, {pipeline_mode = #tpu.pipeline_mode<synchronous>, transform_indices = @transform_4, window_bounds = array<i64: 1, 32>}, {pipeline_mode = #tpu.pipeline_mode<synchronous>, transform_indices = @transform_5, window_bounds = array<i64: 9, 32, 32>}, {pipeline_mode = #tpu.pipeline_mode<synchronous>, transform_indices = @transform_6, window_bounds = array<i64: 1, 32>}, {pipeline_mode = #tpu.pipeline_mode<synchronous>, transform_indices = @transform_7, window_bounds = array<i64: 9, 32, 32>}, {pipeline_mode = #tpu.pipeline_mode<synchronous>, transform_indices = @transform_8, window_bounds = array<i64: 1, 32>}, {pipeline_mode = #tpu.pipeline_mode<synchronous>, transform_indices = @transform_9, window_bounds = array<i64: 32, 128>}, {pipeline_mode = #tpu.pipeline_mode<synchronous>, transform_indices = @transform_10, window_bounds = array<i64: 1, 128>}, {pipeline_mode = #tpu.pipeline_mode<synchronous>, transform_indices = @transform_11, window_bounds = array<i64: 128, 4>}, {pipeline_mode = #tpu.pipeline_mode<synchronous>, transform_indices = @transform_12, window_bounds = array<i64: 1, 4>}, {transform_indices = @transform_13, window_bounds = array<i64: 1, 64, 4>}]} {
    %c0 = arith.constant 0 : index
    %c0_0 = arith.constant 0 : index
    %0 = vector.load %arg2[%c0, %c0_0] : memref<64x1xf32, #tpu.memory_space<vmem>>, vector<64x1xf32>
    %c0_1 = arith.constant 0 : index
    %c0_2 = arith.constant 0 : index
    %1 = vector.load %arg3[%c0_1, %c0_2] : memref<64x1xf32, #tpu.memory_space<vmem>>, vector<64x1xf32>
    %cst = arith.constant 0.000000e+00 : f32
    %2 = vector.broadcast %cst : f32 to vector<64x32xf32>
    %c7 = arith.constant 7 : index
    %c0_3 = arith.constant 0 : index
    %3 = vector.load %arg1[%c7, %c0_3] : memref<96x32xf32, #tpu.memory_space<vmem>>, vector<64x32xf32>
    %4 = vector.broadcast %0 : vector<64x1xf32> to vector<64x32xf32>
    %5 = arith.mulf %3, %4 : vector<64x32xf32>
    %6 = arith.truncf %5 : vector<64x32xf32> to vector<64x32xbf16>
    %c0_4 = arith.constant 0 : index
    %c0_5 = arith.constant 0 : index
    %c0_6 = arith.constant 0 : index
    %7 = vector.load %arg4[%c0_4, %c0_5, %c0_6] : memref<9x32x32xbf16, #tpu.memory_space<vmem>>, vector<1x32x32xbf16>
    %8 = vector.shape_cast %7 : vector<1x32x32xbf16> to vector<32x32xbf16>
    %cst_7 = arith.constant dense<0.000000e+00> : vector<64x32xf32>
    %9 = tpu.matmul %6, %8, %cst_7 {dimension_numbers = #tpu.dot_dimension_numbers<[1], [0], [0], [1], [0, 0, 1, 1], [], []>} : vector<64x32xbf16>, vector<32x32xbf16>, vector<64x32xf32> -> vector<64x32xf32>
    %10 = arith.addf %2, %9 : vector<64x32xf32>
    %c8 = arith.constant 8 : index
    %c0_8 = arith.constant 0 : index
    %11 = vector.load %arg1[%c8, %c0_8] : memref<96x32xf32, #tpu.memory_space<vmem>>, vector<64x32xf32>
    %12 = arith.truncf %11 : vector<64x32xf32> to vector<64x32xbf16>
    %c1 = arith.constant 1 : index
    %c0_9 = arith.constant 0 : index
    %c0_10 = arith.constant 0 : index
    %13 = vector.load %arg4[%c1, %c0_9, %c0_10] : memref<9x32x32xbf16, #tpu.memory_space<vmem>>, vector<1x32x32xbf16>
    %14 = vector.shape_cast %13 : vector<1x32x32xbf16> to vector<32x32xbf16>
    %cst_11 = arith.constant dense<0.000000e+00> : vector<64x32xf32>
    %15 = tpu.matmul %12, %14, %cst_11 {dimension_numbers = #tpu.dot_dimension_numbers<[1], [0], [0], [1], [0, 0, 1, 1], [], []>} : vector<64x32xbf16>, vector<32x32xbf16>, vector<64x32xf32> -> vector<64x32xf32>
    %16 = arith.addf %10, %15 : vector<64x32xf32>
    %c9 = arith.constant 9 : index
    %c0_12 = arith.constant 0 : index
    %17 = vector.load %arg1[%c9, %c0_12] : memref<96x32xf32, #tpu.memory_space<vmem>>, vector<64x32xf32>
    %18 = vector.broadcast %1 : vector<64x1xf32> to vector<64x32xf32>
    %19 = arith.mulf %17, %18 : vector<64x32xf32>
    %20 = arith.truncf %19 : vector<64x32xf32> to vector<64x32xbf16>
    %c2 = arith.constant 2 : index
    %c0_13 = arith.constant 0 : index
    %c0_14 = arith.constant 0 : index
    %21 = vector.load %arg4[%c2, %c0_13, %c0_14] : memref<9x32x32xbf16, #tpu.memory_space<vmem>>, vector<1x32x32xbf16>
    %22 = vector.shape_cast %21 : vector<1x32x32xbf16> to vector<32x32xbf16>
    %cst_15 = arith.constant dense<0.000000e+00> : vector<64x32xf32>
    %23 = tpu.matmul %20, %22, %cst_15 {dimension_numbers = #tpu.dot_dimension_numbers<[1], [0], [0], [1], [0, 0, 1, 1], [], []>} : vector<64x32xbf16>, vector<32x32xbf16>, vector<64x32xf32> -> vector<64x32xf32>
    %24 = arith.addf %16, %23 : vector<64x32xf32>
    %c15 = arith.constant 15 : index
    %c0_16 = arith.constant 0 : index
    %25 = vector.load %arg1[%c15, %c0_16] : memref<96x32xf32, #tpu.memory_space<vmem>>, vector<64x32xf32>
    %26 = vector.broadcast %0 : vector<64x1xf32> to vector<64x32xf32>
    %27 = arith.mulf %25, %26 : vector<64x32xf32>
    %28 = arith.truncf %27 : vector<64x32xf32> to vector<64x32xbf16>
    %c3 = arith.constant 3 : index
    %c0_17 = arith.constant 0 : index
    %c0_18 = arith.constant 0 : index
    %29 = vector.load %arg4[%c3, %c0_17, %c0_18] : memref<9x32x32xbf16, #tpu.memory_space<vmem>>, vector<1x32x32xbf16>
    %30 = vector.shape_cast %29 : vector<1x32x32xbf16> to vector<32x32xbf16>
    %cst_19 = arith.constant dense<0.000000e+00> : vector<64x32xf32>
    %31 = tpu.matmul %28, %30, %cst_19 {dimension_numbers = #tpu.dot_dimension_numbers<[1], [0], [0], [1], [0, 0, 1, 1], [], []>} : vector<64x32xbf16>, vector<32x32xbf16>, vector<64x32xf32> -> vector<64x32xf32>
    %32 = arith.addf %24, %31 : vector<64x32xf32>
    %c16 = arith.constant 16 : index
    %c0_20 = arith.constant 0 : index
    %33 = vector.load %arg1[%c16, %c0_20] : memref<96x32xf32, #tpu.memory_space<vmem>>, vector<64x32xf32>
    %34 = arith.truncf %33 : vector<64x32xf32> to vector<64x32xbf16>
    %c4 = arith.constant 4 : index
    %c0_21 = arith.constant 0 : index
    %c0_22 = arith.constant 0 : index
    %35 = vector.load %arg4[%c4, %c0_21, %c0_22] : memref<9x32x32xbf16, #tpu.memory_space<vmem>>, vector<1x32x32xbf16>
    %36 = vector.shape_cast %35 : vector<1x32x32xbf16> to vector<32x32xbf16>
    %cst_23 = arith.constant dense<0.000000e+00> : vector<64x32xf32>
    %37 = tpu.matmul %34, %36, %cst_23 {dimension_numbers = #tpu.dot_dimension_numbers<[1], [0], [0], [1], [0, 0, 1, 1], [], []>} : vector<64x32xbf16>, vector<32x32xbf16>, vector<64x32xf32> -> vector<64x32xf32>
    %38 = arith.addf %32, %37 : vector<64x32xf32>
    %c17 = arith.constant 17 : index
    %c0_24 = arith.constant 0 : index
    %39 = vector.load %arg1[%c17, %c0_24] : memref<96x32xf32, #tpu.memory_space<vmem>>, vector<64x32xf32>
    %40 = vector.broadcast %1 : vector<64x1xf32> to vector<64x32xf32>
    %41 = arith.mulf %39, %40 : vector<64x32xf32>
    %42 = arith.truncf %41 : vector<64x32xf32> to vector<64x32xbf16>
    %c5 = arith.constant 5 : index
    %c0_25 = arith.constant 0 : index
    %c0_26 = arith.constant 0 : index
    %43 = vector.load %arg4[%c5, %c0_25, %c0_26] : memref<9x32x32xbf16, #tpu.memory_space<vmem>>, vector<1x32x32xbf16>
    %44 = vector.shape_cast %43 : vector<1x32x32xbf16> to vector<32x32xbf16>
    %cst_27 = arith.constant dense<0.000000e+00> : vector<64x32xf32>
    %45 = tpu.matmul %42, %44, %cst_27 {dimension_numbers = #tpu.dot_dimension_numbers<[1], [0], [0], [1], [0, 0, 1, 1], [], []>} : vector<64x32xbf16>, vector<32x32xbf16>, vector<64x32xf32> -> vector<64x32xf32>
    %46 = arith.addf %38, %45 : vector<64x32xf32>
    %c23 = arith.constant 23 : index
    %c0_28 = arith.constant 0 : index
    %47 = vector.load %arg1[%c23, %c0_28] : memref<96x32xf32, #tpu.memory_space<vmem>>, vector<64x32xf32>
    %48 = vector.broadcast %0 : vector<64x1xf32> to vector<64x32xf32>
    %49 = arith.mulf %47, %48 : vector<64x32xf32>
    %50 = arith.truncf %49 : vector<64x32xf32> to vector<64x32xbf16>
    %c6 = arith.constant 6 : index
    %c0_29 = arith.constant 0 : index
    %c0_30 = arith.constant 0 : index
    %51 = vector.load %arg4[%c6, %c0_29, %c0_30] : memref<9x32x32xbf16, #tpu.memory_space<vmem>>, vector<1x32x32xbf16>
    %52 = vector.shape_cast %51 : vector<1x32x32xbf16> to vector<32x32xbf16>
    %cst_31 = arith.constant dense<0.000000e+00> : vector<64x32xf32>
    %53 = tpu.matmul %50, %52, %cst_31 {dimension_numbers = #tpu.dot_dimension_numbers<[1], [0], [0], [1], [0, 0, 1, 1], [], []>} : vector<64x32xbf16>, vector<32x32xbf16>, vector<64x32xf32> -> vector<64x32xf32>
    %54 = arith.addf %46, %53 : vector<64x32xf32>
    %c24 = arith.constant 24 : index
    %c0_32 = arith.constant 0 : index
    %55 = vector.load %arg1[%c24, %c0_32] : memref<96x32xf32, #tpu.memory_space<vmem>>, vector<64x32xf32>
    %56 = arith.truncf %55 : vector<64x32xf32> to vector<64x32xbf16>
    %c7_33 = arith.constant 7 : index
    %c0_34 = arith.constant 0 : index
    %c0_35 = arith.constant 0 : index
    %57 = vector.load %arg4[%c7_33, %c0_34, %c0_35] : memref<9x32x32xbf16, #tpu.memory_space<vmem>>, vector<1x32x32xbf16>
    %58 = vector.shape_cast %57 : vector<1x32x32xbf16> to vector<32x32xbf16>
    %cst_36 = arith.constant dense<0.000000e+00> : vector<64x32xf32>
    %59 = tpu.matmul %56, %58, %cst_36 {dimension_numbers = #tpu.dot_dimension_numbers<[1], [0], [0], [1], [0, 0, 1, 1], [], []>} : vector<64x32xbf16>, vector<32x32xbf16>, vector<64x32xf32> -> vector<64x32xf32>
    %60 = arith.addf %54, %59 : vector<64x32xf32>
    %c25 = arith.constant 25 : index
    %c0_37 = arith.constant 0 : index
    %61 = vector.load %arg1[%c25, %c0_37] : memref<96x32xf32, #tpu.memory_space<vmem>>, vector<64x32xf32>
    %62 = vector.broadcast %1 : vector<64x1xf32> to vector<64x32xf32>
    %63 = arith.mulf %61, %62 : vector<64x32xf32>
    %64 = arith.truncf %63 : vector<64x32xf32> to vector<64x32xbf16>
    %c8_38 = arith.constant 8 : index
    %c0_39 = arith.constant 0 : index
    %c0_40 = arith.constant 0 : index
    %65 = vector.load %arg4[%c8_38, %c0_39, %c0_40] : memref<9x32x32xbf16, #tpu.memory_space<vmem>>, vector<1x32x32xbf16>
    %66 = vector.shape_cast %65 : vector<1x32x32xbf16> to vector<32x32xbf16>
    %cst_41 = arith.constant dense<0.000000e+00> : vector<64x32xf32>
    %67 = tpu.matmul %64, %66, %cst_41 {dimension_numbers = #tpu.dot_dimension_numbers<[1], [0], [0], [1], [0, 0, 1, 1], [], []>} : vector<64x32xbf16>, vector<32x32xbf16>, vector<64x32xf32> -> vector<64x32xf32>
    %68 = arith.addf %60, %67 : vector<64x32xf32>
    %c0_42 = arith.constant 0 : index
    %c0_43 = arith.constant 0 : index
    %69 = vector.load %arg5[%c0_42, %c0_43] : memref<1x32xf32, #tpu.memory_space<vmem>>, vector<1x32xf32>
    %70 = vector.broadcast %69 : vector<1x32xf32> to vector<64x32xf32>
    %71 = arith.addf %68, %70 : vector<64x32xf32>
    %cst_44 = arith.constant 0.000000e+00 : f32
    %72 = vector.broadcast %cst_44 : f32 to vector<64x32xf32>
    %73 = arith.maximumf %71, %72 : vector<64x32xf32>
    %cst_45 = arith.constant 0.000000e+00 : f32
    %74 = vector.broadcast %cst_45 : f32 to vector<96x32xf32>
    %c0_46 = arith.constant 0 : index
    %c0_47 = arith.constant 0 : index
    %75 = vector.load %arg15[%c0_46, %c0_47] : memref<96x32xf32, #tpu.memory_space<vmem>>, vector<96x32xf32>
    tpu.vector_store %arg15[%c0_46, %c0_47], %74 {strides = array<i32>} : memref<96x32xf32, #tpu.memory_space<vmem>>, vector<96x32xf32>,
    %c16_48 = arith.constant 16 : index
    %c0_49 = arith.constant 0 : index
    %76 = vector.load %arg15[%c16_48, %c0_49] : memref<96x32xf32, #tpu.memory_space<vmem>>, vector<64x32xf32>
    tpu.vector_store %arg15[%c16_48, %c0_49], %73 {strides = array<i32>} : memref<96x32xf32, #tpu.memory_space<vmem>>, vector<64x32xf32>,
    %cst_50 = arith.constant 0.000000e+00 : f32
    %77 = vector.broadcast %cst_50 : f32 to vector<64x32xf32>
    %c7_51 = arith.constant 7 : index
    %c0_52 = arith.constant 0 : index
    %78 = vector.load %arg15[%c7_51, %c0_52] : memref<96x32xf32, #tpu.memory_space<vmem>>, vector<64x32xf32>
    %79 = vector.broadcast %0 : vector<64x1xf32> to vector<64x32xf32>
    %80 = arith.mulf %78, %79 : vector<64x32xf32>
    %81 = arith.truncf %80 : vector<64x32xf32> to vector<64x32xbf16>
    %c0_53 = arith.constant 0 : index
    %c0_54 = arith.constant 0 : index
    %c0_55 = arith.constant 0 : index
    %82 = vector.load %arg6[%c0_53, %c0_54, %c0_55] : memref<9x32x32xbf16, #tpu.memory_space<vmem>>, vector<1x32x32xbf16>
    %83 = vector.shape_cast %82 : vector<1x32x32xbf16> to vector<32x32xbf16>
    %cst_56 = arith.constant dense<0.000000e+00> : vector<64x32xf32>
    %84 = tpu.matmul %81, %83, %cst_56 {dimension_numbers = #tpu.dot_dimension_numbers<[1], [0], [0], [1], [0, 0, 1, 1], [], []>} : vector<64x32xbf16>, vector<32x32xbf16>, vector<64x32xf32> -> vector<64x32xf32>
    %85 = arith.addf %77, %84 : vector<64x32xf32>
    %c8_57 = arith.constant 8 : index
    %c0_58 = arith.constant 0 : index
    %86 = vector.load %arg15[%c8_57, %c0_58] : memref<96x32xf32, #tpu.memory_space<vmem>>, vector<64x32xf32>
    %87 = arith.truncf %86 : vector<64x32xf32> to vector<64x32xbf16>
    %c1_59 = arith.constant 1 : index
    %c0_60 = arith.constant 0 : index
    %c0_61 = arith.constant 0 : index
    %88 = vector.load %arg6[%c1_59, %c0_60, %c0_61] : memref<9x32x32xbf16, #tpu.memory_space<vmem>>, vector<1x32x32xbf16>
    %89 = vector.shape_cast %88 : vector<1x32x32xbf16> to vector<32x32xbf16>
    %cst_62 = arith.constant dense<0.000000e+00> : vector<64x32xf32>
    %90 = tpu.matmul %87, %89, %cst_62 {dimension_numbers = #tpu.dot_dimension_numbers<[1], [0], [0], [1], [0, 0, 1, 1], [], []>} : vector<64x32xbf16>, vector<32x32xbf16>, vector<64x32xf32> -> vector<64x32xf32>
    %91 = arith.addf %85, %90 : vector<64x32xf32>
    %c9_63 = arith.constant 9 : index
    %c0_64 = arith.constant 0 : index
    %92 = vector.load %arg15[%c9_63, %c0_64] : memref<96x32xf32, #tpu.memory_space<vmem>>, vector<64x32xf32>
    %93 = vector.broadcast %1 : vector<64x1xf32> to vector<64x32xf32>
    %94 = arith.mulf %92, %93 : vector<64x32xf32>
    %95 = arith.truncf %94 : vector<64x32xf32> to vector<64x32xbf16>
    %c2_65 = arith.constant 2 : index
    %c0_66 = arith.constant 0 : index
    %c0_67 = arith.constant 0 : index
    %96 = vector.load %arg6[%c2_65, %c0_66, %c0_67] : memref<9x32x32xbf16, #tpu.memory_space<vmem>>, vector<1x32x32xbf16>
    %97 = vector.shape_cast %96 : vector<1x32x32xbf16> to vector<32x32xbf16>
    %cst_68 = arith.constant dense<0.000000e+00> : vector<64x32xf32>
    %98 = tpu.matmul %95, %97, %cst_68 {dimension_numbers = #tpu.dot_dimension_numbers<[1], [0], [0], [1], [0, 0, 1, 1], [], []>} : vector<64x32xbf16>, vector<32x32xbf16>, vector<64x32xf32> -> vector<64x32xf32>
    %99 = arith.addf %91, %98 : vector<64x32xf32>
    %c15_69 = arith.constant 15 : index
    %c0_70 = arith.constant 0 : index
    %100 = vector.load %arg15[%c15_69, %c0_70] : memref<96x32xf32, #tpu.memory_space<vmem>>, vector<64x32xf32>
    %101 = vector.broadcast %0 : vector<64x1xf32> to vector<64x32xf32>
    %102 = arith.mulf %100, %101 : vector<64x32xf32>
    %103 = arith.truncf %102 : vector<64x32xf32> to vector<64x32xbf16>
    %c3_71 = arith.constant 3 : index
    %c0_72 = arith.constant 0 : index
    %c0_73 = arith.constant 0 : index
    %104 = vector.load %arg6[%c3_71, %c0_72, %c0_73] : memref<9x32x32xbf16, #tpu.memory_space<vmem>>, vector<1x32x32xbf16>
    %105 = vector.shape_cast %104 : vector<1x32x32xbf16> to vector<32x32xbf16>
    %cst_74 = arith.constant dense<0.000000e+00> : vector<64x32xf32>
    %106 = tpu.matmul %103, %105, %cst_74 {dimension_numbers = #tpu.dot_dimension_numbers<[1], [0], [0], [1], [0, 0, 1, 1], [], []>} : vector<64x32xbf16>, vector<32x32xbf16>, vector<64x32xf32> -> vector<64x32xf32>
    %107 = arith.addf %99, %106 : vector<64x32xf32>
    %c16_75 = arith.constant 16 : index
    %c0_76 = arith.constant 0 : index
    %108 = vector.load %arg15[%c16_75, %c0_76] : memref<96x32xf32, #tpu.memory_space<vmem>>, vector<64x32xf32>
    %109 = arith.truncf %108 : vector<64x32xf32> to vector<64x32xbf16>
    %c4_77 = arith.constant 4 : index
    %c0_78 = arith.constant 0 : index
    %c0_79 = arith.constant 0 : index
    %110 = vector.load %arg6[%c4_77, %c0_78, %c0_79] : memref<9x32x32xbf16, #tpu.memory_space<vmem>>, vector<1x32x32xbf16>
    %111 = vector.shape_cast %110 : vector<1x32x32xbf16> to vector<32x32xbf16>
    %cst_80 = arith.constant dense<0.000000e+00> : vector<64x32xf32>
    %112 = tpu.matmul %109, %111, %cst_80 {dimension_numbers = #tpu.dot_dimension_numbers<[1], [0], [0], [1], [0, 0, 1, 1], [], []>} : vector<64x32xbf16>, vector<32x32xbf16>, vector<64x32xf32> -> vector<64x32xf32>
    %113 = arith.addf %107, %112 : vector<64x32xf32>
    %c17_81 = arith.constant 17 : index
    %c0_82 = arith.constant 0 : index
    %114 = vector.load %arg15[%c17_81, %c0_82] : memref<96x32xf32, #tpu.memory_space<vmem>>, vector<64x32xf32>
    %115 = vector.broadcast %1 : vector<64x1xf32> to vector<64x32xf32>
    %116 = arith.mulf %114, %115 : vector<64x32xf32>
    %117 = arith.truncf %116 : vector<64x32xf32> to vector<64x32xbf16>
    %c5_83 = arith.constant 5 : index
    %c0_84 = arith.constant 0 : index
    %c0_85 = arith.constant 0 : index
    %118 = vector.load %arg6[%c5_83, %c0_84, %c0_85] : memref<9x32x32xbf16, #tpu.memory_space<vmem>>, vector<1x32x32xbf16>
    %119 = vector.shape_cast %118 : vector<1x32x32xbf16> to vector<32x32xbf16>
    %cst_86 = arith.constant dense<0.000000e+00> : vector<64x32xf32>
    %120 = tpu.matmul %117, %119, %cst_86 {dimension_numbers = #tpu.dot_dimension_numbers<[1], [0], [0], [1], [0, 0, 1, 1], [], []>} : vector<64x32xbf16>, vector<32x32xbf16>, vector<64x32xf32> -> vector<64x32xf32>
    %121 = arith.addf %113, %120 : vector<64x32xf32>
    %c23_87 = arith.constant 23 : index
    %c0_88 = arith.constant 0 : index
    %122 = vector.load %arg15[%c23_87, %c0_88] : memref<96x32xf32, #tpu.memory_space<vmem>>, vector<64x32xf32>
    %123 = vector.broadcast %0 : vector<64x1xf32> to vector<64x32xf32>
    %124 = arith.mulf %122, %123 : vector<64x32xf32>
    %125 = arith.truncf %124 : vector<64x32xf32> to vector<64x32xbf16>
    %c6_89 = arith.constant 6 : index
    %c0_90 = arith.constant 0 : index
    %c0_91 = arith.constant 0 : index
    %126 = vector.load %arg6[%c6_89, %c0_90, %c0_91] : memref<9x32x32xbf16, #tpu.memory_space<vmem>>, vector<1x32x32xbf16>
    %127 = vector.shape_cast %126 : vector<1x32x32xbf16> to vector<32x32xbf16>
    %cst_92 = arith.constant dense<0.000000e+00> : vector<64x32xf32>
    %128 = tpu.matmul %125, %127, %cst_92 {dimension_numbers = #tpu.dot_dimension_numbers<[1], [0], [0], [1], [0, 0, 1, 1], [], []>} : vector<64x32xbf16>, vector<32x32xbf16>, vector<64x32xf32> -> vector<64x32xf32>
    %129 = arith.addf %121, %128 : vector<64x32xf32>
    %c24_93 = arith.constant 24 : index
    %c0_94 = arith.constant 0 : index
    %130 = vector.load %arg15[%c24_93, %c0_94] : memref<96x32xf32, #tpu.memory_space<vmem>>, vector<64x32xf32>
    %131 = arith.truncf %130 : vector<64x32xf32> to vector<64x32xbf16>
    %c7_95 = arith.constant 7 : index
    %c0_96 = arith.constant 0 : index
    %c0_97 = arith.constant 0 : index
    %132 = vector.load %arg6[%c7_95, %c0_96, %c0_97] : memref<9x32x32xbf16, #tpu.memory_space<vmem>>, vector<1x32x32xbf16>
    %133 = vector.shape_cast %132 : vector<1x32x32xbf16> to vector<32x32xbf16>
    %cst_98 = arith.constant dense<0.000000e+00> : vector<64x32xf32>
    %134 = tpu.matmul %131, %133, %cst_98 {dimension_numbers = #tpu.dot_dimension_numbers<[1], [0], [0], [1], [0, 0, 1, 1], [], []>} : vector<64x32xbf16>, vector<32x32xbf16>, vector<64x32xf32> -> vector<64x32xf32>
    %135 = arith.addf %129, %134 : vector<64x32xf32>
    %c25_99 = arith.constant 25 : index
    %c0_100 = arith.constant 0 : index
    %136 = vector.load %arg15[%c25_99, %c0_100] : memref<96x32xf32, #tpu.memory_space<vmem>>, vector<64x32xf32>
    %137 = vector.broadcast %1 : vector<64x1xf32> to vector<64x32xf32>
    %138 = arith.mulf %136, %137 : vector<64x32xf32>
    %139 = arith.truncf %138 : vector<64x32xf32> to vector<64x32xbf16>
    %c8_101 = arith.constant 8 : index
    %c0_102 = arith.constant 0 : index
    %c0_103 = arith.constant 0 : index
    %140 = vector.load %arg6[%c8_101, %c0_102, %c0_103] : memref<9x32x32xbf16, #tpu.memory_space<vmem>>, vector<1x32x32xbf16>
    %141 = vector.shape_cast %140 : vector<1x32x32xbf16> to vector<32x32xbf16>
    %cst_104 = arith.constant dense<0.000000e+00> : vector<64x32xf32>
    %142 = tpu.matmul %139, %141, %cst_104 {dimension_numbers = #tpu.dot_dimension_numbers<[1], [0], [0], [1], [0, 0, 1, 1], [], []>} : vector<64x32xbf16>, vector<32x32xbf16>, vector<64x32xf32> -> vector<64x32xf32>
    %143 = arith.addf %135, %142 : vector<64x32xf32>
    %c0_105 = arith.constant 0 : index
    %c0_106 = arith.constant 0 : index
    %144 = vector.load %arg7[%c0_105, %c0_106] : memref<1x32xf32, #tpu.memory_space<vmem>>, vector<1x32xf32>
    %145 = vector.broadcast %144 : vector<1x32xf32> to vector<64x32xf32>
    %146 = arith.addf %143, %145 : vector<64x32xf32>
    %cst_107 = arith.constant 0.000000e+00 : f32
    %147 = vector.broadcast %cst_107 : f32 to vector<64x32xf32>
    %148 = arith.maximumf %146, %147 : vector<64x32xf32>
    %cst_108 = arith.constant 0.000000e+00 : f32
    %149 = vector.broadcast %cst_108 : f32 to vector<96x32xf32>
    %c0_109 = arith.constant 0 : index
    %c0_110 = arith.constant 0 : index
    %150 = vector.load %arg16[%c0_109, %c0_110] : memref<96x32xf32, #tpu.memory_space<vmem>>, vector<96x32xf32>
    tpu.vector_store %arg16[%c0_109, %c0_110], %149 {strides = array<i32>} : memref<96x32xf32, #tpu.memory_space<vmem>>, vector<96x32xf32>,
    %c16_111 = arith.constant 16 : index
    %c0_112 = arith.constant 0 : index
    %151 = vector.load %arg16[%c16_111, %c0_112] : memref<96x32xf32, #tpu.memory_space<vmem>>, vector<64x32xf32>
    tpu.vector_store %arg16[%c16_111, %c0_112], %148 {strides = array<i32>} : memref<96x32xf32, #tpu.memory_space<vmem>>, vector<64x32xf32>,
    %cst_113 = arith.constant 0.000000e+00 : f32
    %152 = vector.broadcast %cst_113 : f32 to vector<64x32xf32>
    %c7_114 = arith.constant 7 : index
    %c0_115 = arith.constant 0 : index
    %153 = vector.load %arg16[%c7_114, %c0_115] : memref<96x32xf32, #tpu.memory_space<vmem>>, vector<64x32xf32>
    %154 = vector.broadcast %0 : vector<64x1xf32> to vector<64x32xf32>
    %155 = arith.mulf %153, %154 : vector<64x32xf32>
    %156 = arith.truncf %155 : vector<64x32xf32> to vector<64x32xbf16>
    %c0_116 = arith.constant 0 : index
    %c0_117 = arith.constant 0 : index
    %c0_118 = arith.constant 0 : index
    %157 = vector.load %arg8[%c0_116, %c0_117, %c0_118] : memref<9x32x32xbf16, #tpu.memory_space<vmem>>, vector<1x32x32xbf16>
    %158 = vector.shape_cast %157 : vector<1x32x32xbf16> to vector<32x32xbf16>
    %cst_119 = arith.constant dense<0.000000e+00> : vector<64x32xf32>
    %159 = tpu.matmul %156, %158, %cst_119 {dimension_numbers = #tpu.dot_dimension_numbers<[1], [0], [0], [1], [0, 0, 1, 1], [], []>} : vector<64x32xbf16>, vector<32x32xbf16>, vector<64x32xf32> -> vector<64x32xf32>
    %160 = arith.addf %152, %159 : vector<64x32xf32>
    %c8_120 = arith.constant 8 : index
    %c0_121 = arith.constant 0 : index
    %161 = vector.load %arg16[%c8_120, %c0_121] : memref<96x32xf32, #tpu.memory_space<vmem>>, vector<64x32xf32>
    %162 = arith.truncf %161 : vector<64x32xf32> to vector<64x32xbf16>
    %c1_122 = arith.constant 1 : index
    %c0_123 = arith.constant 0 : index
    %c0_124 = arith.constant 0 : index
    %163 = vector.load %arg8[%c1_122, %c0_123, %c0_124] : memref<9x32x32xbf16, #tpu.memory_space<vmem>>, vector<1x32x32xbf16>
    %164 = vector.shape_cast %163 : vector<1x32x32xbf16> to vector<32x32xbf16>
    %cst_125 = arith.constant dense<0.000000e+00> : vector<64x32xf32>
    %165 = tpu.matmul %162, %164, %cst_125 {dimension_numbers = #tpu.dot_dimension_numbers<[1], [0], [0], [1], [0, 0, 1, 1], [], []>} : vector<64x32xbf16>, vector<32x32xbf16>, vector<64x32xf32> -> vector<64x32xf32>
    %166 = arith.addf %160, %165 : vector<64x32xf32>
    %c9_126 = arith.constant 9 : index
    %c0_127 = arith.constant 0 : index
    %167 = vector.load %arg16[%c9_126, %c0_127] : memref<96x32xf32, #tpu.memory_space<vmem>>, vector<64x32xf32>
    %168 = vector.broadcast %1 : vector<64x1xf32> to vector<64x32xf32>
    %169 = arith.mulf %167, %168 : vector<64x32xf32>
    %170 = arith.truncf %169 : vector<64x32xf32> to vector<64x32xbf16>
    %c2_128 = arith.constant 2 : index
    %c0_129 = arith.constant 0 : index
    %c0_130 = arith.constant 0 : index
    %171 = vector.load %arg8[%c2_128, %c0_129, %c0_130] : memref<9x32x32xbf16, #tpu.memory_space<vmem>>, vector<1x32x32xbf16>
    %172 = vector.shape_cast %171 : vector<1x32x32xbf16> to vector<32x32xbf16>
    %cst_131 = arith.constant dense<0.000000e+00> : vector<64x32xf32>
    %173 = tpu.matmul %170, %172, %cst_131 {dimension_numbers = #tpu.dot_dimension_numbers<[1], [0], [0], [1], [0, 0, 1, 1], [], []>} : vector<64x32xbf16>, vector<32x32xbf16>, vector<64x32xf32> -> vector<64x32xf32>
    %174 = arith.addf %166, %173 : vector<64x32xf32>
    %c15_132 = arith.constant 15 : index
    %c0_133 = arith.constant 0 : index
    %175 = vector.load %arg16[%c15_132, %c0_133] : memref<96x32xf32, #tpu.memory_space<vmem>>, vector<64x32xf32>
    %176 = vector.broadcast %0 : vector<64x1xf32> to vector<64x32xf32>
    %177 = arith.mulf %175, %176 : vector<64x32xf32>
    %178 = arith.truncf %177 : vector<64x32xf32> to vector<64x32xbf16>
    %c3_134 = arith.constant 3 : index
    %c0_135 = arith.constant 0 : index
    %c0_136 = arith.constant 0 : index
    %179 = vector.load %arg8[%c3_134, %c0_135, %c0_136] : memref<9x32x32xbf16, #tpu.memory_space<vmem>>, vector<1x32x32xbf16>
    %180 = vector.shape_cast %179 : vector<1x32x32xbf16> to vector<32x32xbf16>
    %cst_137 = arith.constant dense<0.000000e+00> : vector<64x32xf32>
    %181 = tpu.matmul %178, %180, %cst_137 {dimension_numbers = #tpu.dot_dimension_numbers<[1], [0], [0], [1], [0, 0, 1, 1], [], []>} : vector<64x32xbf16>, vector<32x32xbf16>, vector<64x32xf32> -> vector<64x32xf32>
    %182 = arith.addf %174, %181 : vector<64x32xf32>
    %c16_138 = arith.constant 16 : index
    %c0_139 = arith.constant 0 : index
    %183 = vector.load %arg16[%c16_138, %c0_139] : memref<96x32xf32, #tpu.memory_space<vmem>>, vector<64x32xf32>
    %184 = arith.truncf %183 : vector<64x32xf32> to vector<64x32xbf16>
    %c4_140 = arith.constant 4 : index
    %c0_141 = arith.constant 0 : index
    %c0_142 = arith.constant 0 : index
    %185 = vector.load %arg8[%c4_140, %c0_141, %c0_142] : memref<9x32x32xbf16, #tpu.memory_space<vmem>>, vector<1x32x32xbf16>
    %186 = vector.shape_cast %185 : vector<1x32x32xbf16> to vector<32x32xbf16>
    %cst_143 = arith.constant dense<0.000000e+00> : vector<64x32xf32>
    %187 = tpu.matmul %184, %186, %cst_143 {dimension_numbers = #tpu.dot_dimension_numbers<[1], [0], [0], [1], [0, 0, 1, 1], [], []>} : vector<64x32xbf16>, vector<32x32xbf16>, vector<64x32xf32> -> vector<64x32xf32>
    %188 = arith.addf %182, %187 : vector<64x32xf32>
    %c17_144 = arith.constant 17 : index
    %c0_145 = arith.constant 0 : index
    %189 = vector.load %arg16[%c17_144, %c0_145] : memref<96x32xf32, #tpu.memory_space<vmem>>, vector<64x32xf32>
    %190 = vector.broadcast %1 : vector<64x1xf32> to vector<64x32xf32>
    %191 = arith.mulf %189, %190 : vector<64x32xf32>
    %192 = arith.truncf %191 : vector<64x32xf32> to vector<64x32xbf16>
    %c5_146 = arith.constant 5 : index
    %c0_147 = arith.constant 0 : index
    %c0_148 = arith.constant 0 : index
    %193 = vector.load %arg8[%c5_146, %c0_147, %c0_148] : memref<9x32x32xbf16, #tpu.memory_space<vmem>>, vector<1x32x32xbf16>
    %194 = vector.shape_cast %193 : vector<1x32x32xbf16> to vector<32x32xbf16>
    %cst_149 = arith.constant dense<0.000000e+00> : vector<64x32xf32>
    %195 = tpu.matmul %192, %194, %cst_149 {dimension_numbers = #tpu.dot_dimension_numbers<[1], [0], [0], [1], [0, 0, 1, 1], [], []>} : vector<64x32xbf16>, vector<32x32xbf16>, vector<64x32xf32> -> vector<64x32xf32>
    %196 = arith.addf %188, %195 : vector<64x32xf32>
    %c23_150 = arith.constant 23 : index
    %c0_151 = arith.constant 0 : index
    %197 = vector.load %arg16[%c23_150, %c0_151] : memref<96x32xf32, #tpu.memory_space<vmem>>, vector<64x32xf32>
    %198 = vector.broadcast %0 : vector<64x1xf32> to vector<64x32xf32>
    %199 = arith.mulf %197, %198 : vector<64x32xf32>
    %200 = arith.truncf %199 : vector<64x32xf32> to vector<64x32xbf16>
    %c6_152 = arith.constant 6 : index
    %c0_153 = arith.constant 0 : index
    %c0_154 = arith.constant 0 : index
    %201 = vector.load %arg8[%c6_152, %c0_153, %c0_154] : memref<9x32x32xbf16, #tpu.memory_space<vmem>>, vector<1x32x32xbf16>
    %202 = vector.shape_cast %201 : vector<1x32x32xbf16> to vector<32x32xbf16>
    %cst_155 = arith.constant dense<0.000000e+00> : vector<64x32xf32>
    %203 = tpu.matmul %200, %202, %cst_155 {dimension_numbers = #tpu.dot_dimension_numbers<[1], [0], [0], [1], [0, 0, 1, 1], [], []>} : vector<64x32xbf16>, vector<32x32xbf16>, vector<64x32xf32> -> vector<64x32xf32>
    %204 = arith.addf %196, %203 : vector<64x32xf32>
    %c24_156 = arith.constant 24 : index
    %c0_157 = arith.constant 0 : index
    %205 = vector.load %arg16[%c24_156, %c0_157] : memref<96x32xf32, #tpu.memory_space<vmem>>, vector<64x32xf32>
    %206 = arith.truncf %205 : vector<64x32xf32> to vector<64x32xbf16>
    %c7_158 = arith.constant 7 : index
    %c0_159 = arith.constant 0 : index
    %c0_160 = arith.constant 0 : index
    %207 = vector.load %arg8[%c7_158, %c0_159, %c0_160] : memref<9x32x32xbf16, #tpu.memory_space<vmem>>, vector<1x32x32xbf16>
    %208 = vector.shape_cast %207 : vector<1x32x32xbf16> to vector<32x32xbf16>
    %cst_161 = arith.constant dense<0.000000e+00> : vector<64x32xf32>
    %209 = tpu.matmul %206, %208, %cst_161 {dimension_numbers = #tpu.dot_dimension_numbers<[1], [0], [0], [1], [0, 0, 1, 1], [], []>} : vector<64x32xbf16>, vector<32x32xbf16>, vector<64x32xf32> -> vector<64x32xf32>
    %210 = arith.addf %204, %209 : vector<64x32xf32>
    %c25_162 = arith.constant 25 : index
    %c0_163 = arith.constant 0 : index
    %211 = vector.load %arg16[%c25_162, %c0_163] : memref<96x32xf32, #tpu.memory_space<vmem>>, vector<64x32xf32>
    %212 = vector.broadcast %1 : vector<64x1xf32> to vector<64x32xf32>
    %213 = arith.mulf %211, %212 : vector<64x32xf32>
    %214 = arith.truncf %213 : vector<64x32xf32> to vector<64x32xbf16>
    %c8_164 = arith.constant 8 : index
    %c0_165 = arith.constant 0 : index
    %c0_166 = arith.constant 0 : index
    %215 = vector.load %arg8[%c8_164, %c0_165, %c0_166] : memref<9x32x32xbf16, #tpu.memory_space<vmem>>, vector<1x32x32xbf16>
    %216 = vector.shape_cast %215 : vector<1x32x32xbf16> to vector<32x32xbf16>
    %cst_167 = arith.constant dense<0.000000e+00> : vector<64x32xf32>
    %217 = tpu.matmul %214, %216, %cst_167 {dimension_numbers = #tpu.dot_dimension_numbers<[1], [0], [0], [1], [0, 0, 1, 1], [], []>} : vector<64x32xbf16>, vector<32x32xbf16>, vector<64x32xf32> -> vector<64x32xf32>
    %218 = arith.addf %210, %217 : vector<64x32xf32>
    %c0_168 = arith.constant 0 : index
    %c0_169 = arith.constant 0 : index
    %219 = vector.load %arg9[%c0_168, %c0_169] : memref<1x32xf32, #tpu.memory_space<vmem>>, vector<1x32xf32>
    %220 = vector.broadcast %219 : vector<1x32xf32> to vector<64x32xf32>
    %221 = arith.addf %218, %220 : vector<64x32xf32>
    %cst_170 = arith.constant 0.000000e+00 : f32
    %222 = vector.broadcast %cst_170 : f32 to vector<64x32xf32>
    %223 = arith.maximumf %221, %222 : vector<64x32xf32>
    %224 = arith.truncf %223 : vector<64x32xf32> to vector<64x32xbf16>
    %c0_171 = arith.constant 0 : index
    %c0_172 = arith.constant 0 : index
    %225 = vector.load %arg10[%c0_171, %c0_172] : memref<32x128xbf16, #tpu.memory_space<vmem>>, vector<32x128xbf16>
    %cst_173 = arith.constant dense<0.000000e+00> : vector<64x128xf32>
    %226 = tpu.matmul %224, %225, %cst_173 {dimension_numbers = #tpu.dot_dimension_numbers<[1], [0], [0], [1], [0, 0, 1, 1], [], []>} : vector<64x32xbf16>, vector<32x128xbf16>, vector<64x128xf32> -> vector<64x128xf32>
    %c0_174 = arith.constant 0 : index
    %c0_175 = arith.constant 0 : index
    %227 = vector.load %arg11[%c0_174, %c0_175] : memref<1x128xf32, #tpu.memory_space<vmem>>, vector<1x128xf32>
    %228 = vector.broadcast %227 : vector<1x128xf32> to vector<64x128xf32>
    %229 = arith.addf %226, %228 : vector<64x128xf32>
    %cst_176 = arith.constant 0.000000e+00 : f32
    %230 = vector.broadcast %cst_176 : f32 to vector<64x128xf32>
    %231 = arith.maximumf %229, %230 : vector<64x128xf32>
    %232 = arith.truncf %231 : vector<64x128xf32> to vector<64x128xbf16>
    %c0_177 = arith.constant 0 : index
    %c0_178 = arith.constant 0 : index
    %233 = vector.load %arg12[%c0_177, %c0_178] : memref<128x4xbf16, #tpu.memory_space<vmem>>, vector<128x4xbf16>
    %cst_179 = arith.constant dense<0.000000e+00> : vector<64x4xf32>
    %234 = tpu.matmul %232, %233, %cst_179 {dimension_numbers = #tpu.dot_dimension_numbers<[1], [0], [0], [1], [0, 0, 1, 1], [], []>} : vector<64x128xbf16>, vector<128x4xbf16>, vector<64x4xf32> -> vector<64x4xf32>
    %c0_180 = arith.constant 0 : index
    %c0_181 = arith.constant 0 : index
    %235 = vector.load %arg13[%c0_180, %c0_181] : memref<1x4xf32, #tpu.memory_space<vmem>>, vector<1x4xf32>
    %236 = vector.broadcast %235 : vector<1x4xf32> to vector<64x4xf32>
    %237 = arith.addf %234, %236 : vector<64x4xf32>
    %238 = vector.shape_cast %237 : vector<64x4xf32> to vector<1x64x4xf32>
    %c0_182 = arith.constant 0 : index
    %c0_183 = arith.constant 0 : index
    %c0_184 = arith.constant 0 : index
    %239 = vector.load %arg14[%c0_182, %c0_183, %c0_184] : memref<1x64x4xf32, #tpu.memory_space<vmem>>, vector<1x64x4xf32>
    tpu.vector_store %arg14[%c0_182, %c0_183, %c0_184], %238 {strides = array<i32>} : memref<1x64x4xf32, #tpu.memory_space<vmem>>, vector<1x64x4xf32>,
    return
  }
  func.func @transform_0(%arg0: i32) -> (i32, i32) {
    %c0_i32 = arith.constant 0 : i32
    %c0_i32_0 = arith.constant 0 : i32
    return %arg0, %c0_i32 : i32, i32
  }
  func.func @transform_1(%arg0: i32) -> (i32, i32) {
    %c0_i32 = arith.constant 0 : i32
    %c0_i32_0 = arith.constant 0 : i32
    %c0_i32_1 = arith.constant 0 : i32
    return %c0_i32, %c0_i32_0 : i32, i32
  }
  func.func @transform_2(%arg0: i32) -> (i32, i32) {
    %c0_i32 = arith.constant 0 : i32
    %c0_i32_0 = arith.constant 0 : i32
    %c0_i32_1 = arith.constant 0 : i32
    return %c0_i32, %c0_i32_0 : i32, i32
  }
  func.func @transform_3(%arg0: i32) -> (i32, i32, i32) {
    %c0_i32 = arith.constant 0 : i32
    %c0_i32_0 = arith.constant 0 : i32
    %c0_i32_1 = arith.constant 0 : i32
    %c0_i32_2 = arith.constant 0 : i32
    return %c0_i32, %c0_i32_0, %c0_i32_1 : i32, i32, i32
  }
  func.func @transform_4(%arg0: i32) -> (i32, i32) {
    %c0_i32 = arith.constant 0 : i32
    %c0_i32_0 = arith.constant 0 : i32
    %c0_i32_1 = arith.constant 0 : i32
    return %c0_i32, %c0_i32_0 : i32, i32
  }
  func.func @transform_5(%arg0: i32) -> (i32, i32, i32) {
    %c0_i32 = arith.constant 0 : i32
    %c0_i32_0 = arith.constant 0 : i32
    %c0_i32_1 = arith.constant 0 : i32
    %c0_i32_2 = arith.constant 0 : i32
    return %c0_i32, %c0_i32_0, %c0_i32_1 : i32, i32, i32
  }
  func.func @transform_6(%arg0: i32) -> (i32, i32) {
    %c0_i32 = arith.constant 0 : i32
    %c0_i32_0 = arith.constant 0 : i32
    %c0_i32_1 = arith.constant 0 : i32
    return %c0_i32, %c0_i32_0 : i32, i32
  }
  func.func @transform_7(%arg0: i32) -> (i32, i32, i32) {
    %c0_i32 = arith.constant 0 : i32
    %c0_i32_0 = arith.constant 0 : i32
    %c0_i32_1 = arith.constant 0 : i32
    %c0_i32_2 = arith.constant 0 : i32
    return %c0_i32, %c0_i32_0, %c0_i32_1 : i32, i32, i32
  }
  func.func @transform_8(%arg0: i32) -> (i32, i32) {
    %c0_i32 = arith.constant 0 : i32
    %c0_i32_0 = arith.constant 0 : i32
    %c0_i32_1 = arith.constant 0 : i32
    return %c0_i32, %c0_i32_0 : i32, i32
  }
  func.func @transform_9(%arg0: i32) -> (i32, i32) {
    %c0_i32 = arith.constant 0 : i32
    %c0_i32_0 = arith.constant 0 : i32
    %c0_i32_1 = arith.constant 0 : i32
    return %c0_i32, %c0_i32_0 : i32, i32
  }
  func.func @transform_10(%arg0: i32) -> (i32, i32) {
    %c0_i32 = arith.constant 0 : i32
    %c0_i32_0 = arith.constant 0 : i32
    %c0_i32_1 = arith.constant 0 : i32
    return %c0_i32, %c0_i32_0 : i32, i32
  }
  func.func @transform_11(%arg0: i32) -> (i32, i32) {
    %c0_i32 = arith.constant 0 : i32
    %c0_i32_0 = arith.constant 0 : i32
    %c0_i32_1 = arith.constant 0 : i32
    return %c0_i32, %c0_i32_0 : i32, i32
  }
  func.func @transform_12(%arg0: i32) -> (i32, i32) {
    %c0_i32 = arith.constant 0 : i32
    %c0_i32_0 = arith.constant 0 : i32
    %c0_i32_1 = arith.constant 0 : i32
    return %c0_i32, %c0_i32_0 : i32, i32
  }
  func.func @transform_13(%arg0: i32) -> (i32, i32, i32) {
    %c0_i32 = arith.constant 0 : i32
    %c0_i32_0 = arith.constant 0 : i32
    %c0_i32_1 = arith.constant 0 : i32
    return %arg0, %c0_i32, %c0_i32_0 : i32, i32, i32
  }
}

</mosaic_0001>

<bundles_post_ra>
// kernel: tile.12
= control target key start
LH: loop header
LB: loop body
LE: loop exit
PB: predicated region body
PF: predicated region fallthrough
CT: control target
= control target key end

     0   :  { %s22_s0 = inlined_call_operand.vmem [shape: f32[32], index: 0, kind: input, shape index: {}]   ;;  %s23_s1 = inlined_call_operand.vmem [shape: f32[4,32], index: 1, kind: output, shape index: {}]  }
   0x1   :  { %v4_v0 = vld [vmem:[%s22_s0] ss:$0 sm:$0xff] }
   0x2   :  { %5 = vst [vmem:[%s23_s1] sm:$0xf] %v4_v0 }

// kernel: tile.13
= control target key start
LH: loop header
LB: loop body
LE: loop exit
PB: predicated region body
PF: predicated region fallthrough
CT: control target
= control target key end

     0   :  { %vm8_vm0 = vcmask 261120   ;;  %s40_s8 = smov 32   ;;  %s41_s9 = smov 64   ;;  %vm14_vm1 = vcmask 1048320   ;;  %vm20_vm2 = vcmask 785920   ;;  %vm26_vm3 = vcmask 523520   ;;  %s58_s0 = inlined_call_operand.vmem [shape: f32[4,32], index: 0, kind: input, shape index: {}]   ;;  %s59_s1 = inlined_call_operand.vmem [shape: f32[1,128], index: 1, kind: output, shape index: {}]  }
   0x1   :  { %v5_v0 = vld [vmem:[%s58_s0] sm:$0xf]  ;;  %s39_s0 = smov 96  }
   0x2   :  { %6 = vst [vmem:[#allocation1] sm:$0xf] %v5_v0 }
   0x9   :  { %v11_v1 = vld [vmem:[#allocation1 + $0x3] sm:$0x1]   ;;  %v23_v2 = vld [vmem:[#allocation1 + $0x1] sm:$0x1]   ;;  %v7_v3 = vld [vmem:[#allocation1] sm:$0x1]  }
   0xa   :  { %12 = vrot.lane.b32.xlu0 %v11_v1, %s39_s0  ;;  %24 = vrot.lane.b32.xlu1 %v23_v2, %s40_s8  ;;  %v17_v4 = vld [vmem:[#allocation1 + $0x2] sm:$0x1]   ;;  %9 = vst.msk [vmem:[#allocation0] sm:$0x1] %vm8_vm0, %v7_v3  }
   0xe   :  { %18 = vrot.lane.b32.xlu0 %v17_v4, %s41_s9 }
  0x7c   :  { %v13_v5 = vpop.permute.xlu0 %12   ;;  %v25_v6 = vpop.permute.xlu1 %24  }
  0x7d   :  { %15 = vst.msk [vmem:[#allocation0] sm:$0x1] %vm14_vm1, %v13_v5  }
  0x80   :  { %v19_v7 = vpop.permute.xlu0 %18  }
  0x81   :  { %21 = vst.msk [vmem:[#allocation0] sm:$0x1] %vm20_vm2, %v19_v7  }
  0x82   :  { %27 = vst.msk [vmem:[#allocation0] sm:$0x1] %vm26_vm3, %v25_v6  }
  0x89   :  { %v32_v8 = vld [vmem:[#allocation0] sm:$0x1] }
  0x8a   :  { %35 = vst [vmem:[%s59_s1] sm:$0x1] %v32_v8 }

// kernel: roi_align_mask_head_forward.1
= control target key start
LH: loop header
LB: loop body
LE: loop exit
PB: predicated region body
PF: predicated region fallthrough
CT: control target
= control target key end

     0   :  { %s5121_s25 = smov 0   ;;  %s6208_s0 = inlined_call_operand.vmem [shape: f32[192,32], index: 0, kind: input, shape index: {}]   ;;  %s6209_s1 = inlined_call_operand.vmem [shape: f32[64,1], index: 1, kind: input, shape index: {}]   ;;  %s6210_s2 = inlined_call_operand.vmem [shape: f32[64,1], index: 2, kind: input, shape index: {}]   ;;  %s6211_s3 = inlined_call_operand.vmem [shape: bf16[9,32,32], index: 3, kind: input, shape index: {}]   ;;  %s6212_s4 = inlined_call_operand.vmem [shape: f32[1,32], index: 4, kind: input, shape index: {}]   ;;  %s6213_s5 = inlined_call_operand.vmem [shape: bf16[9,32,32], index: 5, kind: input, shape index: {}]   ;;  %s6214_s6 = inlined_call_operand.vmem [shape: f32[1,32], index: 6, kind: input, shape index: {}]   ;;  %s6215_s7 = inlined_call_operand.vmem [shape: bf16[9,32,32], index: 7, kind: input, shape index: {}]   ;;  %s6216_s8 = inlined_call_operand.vmem [shape: f32[1,32], index: 8, kind: input, shape index: {}]   ;;  %s6217_s9 = inlined_call_operand.vmem [shape: bf16[32,128], index: 9, kind: input, shape index: {}]   ;;  %s6218_s10 = inlined_call_operand.vmem [shape: f32[1,128], index: 10, kind: input, shape index: {}]   ;;  %s6219_s11 = inlined_call_operand.vmem [shape: bf16[128,4], index: 11, kind: input, shape index: {}]   ;;  %s6220_s12 = inlined_call_operand.vmem [shape: f32[1,4], index: 12, kind: input, shape index: {}]   ;;  %s6221_s13 = inlined_call_operand.vmem [shape: f32[2,64,4], index: 13, kind: output, shape index: {}]  }
   0x1 LB: > { %s5127_s26 = sadd.s32 4294967295, %s5047_s25   ;;  %p4141_p0 = scmp.ge.s32.totalorder %s5047_s25, 1  ;;  %s5047_s25 = sphi %s5121_s25, %s23_s25  }
   0x2   : > { %p388_p1 = scmp.lt.s32.totalorder %s5047_s25, 3 }
   0x4   : > { %p389_p2 = pnand %p4141_p0, %p388_p1 }
   0x6   : > { %392 = sbr.rel (%p389_p2) target bundleno = 1391 (0x56f), region = 72 }
   0xb   : > { %v446_v0 = vld [vmem:[%s6209_s1 + $0x10] sm:$0xff]  ;;  %v444_v1 = vld [vmem:[%s6209_s1] sm:$0xff]  ;;  %s432_s14 = smul.u32 12, %s5127_s26  ;;  %vm553_vm0 = vcmask 261120   ;;  %v5049_v2 = vmov 0   ;;  %v5050_v3 = vmov 0.0  }
   0xc   : > { %4976 = vset.pattern.permute.xlu1 %v5049_v2  ;;  %4975 = vset.pattern.permute.xlu0 %v5049_v2  ;;  %1625 = vst.msk [vmem:[#allocation2 + $0x20] sm:$0xff] %vm553_vm0, %v5050_v3  ;;  %1621 = vst.msk [vmem:[#allocation2] sm:$0xff] %vm553_vm0, %v5050_v3  ;;  %v447_v4 = vld [vmem:[%s6209_s1 + $0x18] sm:$0xff]  ;;  %v445_v5 = vld [vmem:[%s6209_s1 + $0x8] sm:$0xff]  ;;  %p438_p4 = scmp.lt.s32.totalorder %s5127_s26, 1  ;;  %vm4073_vm1 = vcmask 31744  }
   0xd   : > { %480 = vperm.xlu1 %4976, %v446_v0   ;;  %470 = vperm.xlu0 %4975, %v444_v1   ;;  %p5140_p3 = scmp.lt.s32.totalorder %s432_s14, 23  ;;  %1622 = vst.msk [vmem:[#allocation2 + $0x8] sm:$0xff] %vm553_vm0, %v5050_v3  ;;  %1623 = vst.msk [vmem:[#allocation2 + $0x10] sm:$0xff] %vm553_vm0, %v5050_v3  ;;  %v453_v6 = vld [vmem:[%s6210_s2 + $0x8] sm:$0xff]  ;;  %v452_v7 = vld [vmem:[%s6210_s2] sm:$0xff] }
   0xe   : > { %1624 = vst.msk [vmem:[#allocation2 + $0x18] sm:$0xff] %vm553_vm0, %v5050_v3  ;;  %1626 = vst.msk [vmem:[#allocation2 + $0x28] sm:$0xff] %vm553_vm0, %v5050_v3  ;;  %v4977_v8 = vld [vmem:[%s6211_s3 + $0x18] sm:$0xff]   ;;  %v4978_v9 = vld [vmem:[%s6211_s3 + $0x10] sm:$0xff]   ;;  %s6352_s26 = smov (!%p438_p4, %s5127_s26), 1 }
   0xf   : > { %1627 = vst.msk [vmem:[#allocation2 + $0x30] sm:$0xff] %vm553_vm0, %v5050_v3  ;;  %1628 = vst.msk [vmem:[#allocation2 + $0x38] sm:$0xff] %vm553_vm0, %v5050_v3  ;;  %s6350_s14 = smov (!%p5140_p3, %s432_s14), 23  ;;  %4605 = vmatprep.subr.bf16.mxu1 %v4977_v8  ;;  %v455_v12 = vld [vmem:[%s6210_s2 + $0x18] sm:$0xff]  ;;  %v454_v16 = vld [vmem:[%s6210_s2 + $0x10] sm:$0xff]  ;;  %s4424_s22 = sshll.u32 %s6352_s26, 6 }
  0x10   : > { %1629 = vst.msk [vmem:[#allocation2 + $0x40] sm:$0xff] %vm553_vm0, %v5050_v3  ;;  %1630 = vst.msk [vmem:[#allocation2 + $0x48] sm:$0xff] %vm553_vm0, %v5050_v3  ;;  %s4142_s28 = sshll.u32 %s6350_s14, 3  ;;  %4606 = vmatpush3.bf16.msra.mxu1 %v4977_v8  ;;  %v4979_v19 = vld [vmem:[%s6211_s3 + $0x8] sm:$0xff]   ;;  %v448_v24 = vld [vmem:[%s6209_s1 + $0x20] sm:$0xff]  ;;  %s442_s29 = scalar_lea.vmem %s6221_s13, %s4424_s22 }
  0x11   : > { %1631 = vst.msk [vmem:[#allocation2 + $0x50] sm:$0xff] %vm553_vm0, %v5050_v3  ;;  %1632 = vst.msk [vmem:[#allocation2 + $0x58] sm:$0xff] %vm553_vm0, %v5050_v3  ;;  %485 = vperm.xlu1 %4976, %v447_v4   ;;  %475 = vperm.xlu0 %4975, %v445_v5   ;;  %s5193_s17 = scalar_lea.vmem %s6208_s0, %s4142_s28  ;;  %v4981_v22 = vld [vmem:[%s6211_s3 + $0x28] sm:$0xff]   ;;  %v4980_v25 = vld [vmem:[%s6211_s3] sm:$0xff]  }
  0x12   : > { %2721 = vst.msk [vmem:[#allocation3] sm:$0xff] %vm553_vm0, %v5050_v3  ;;  %2722 = vst.msk [vmem:[#allocation3 + $0x8] sm:$0xff] %vm553_vm0, %v5050_v3  ;;  %v524_v10 = vld [vmem:[%s5193_s17 + $0x8] sm:$0xff]  ;;  %v5197_v11 = vld [vmem:[%s5193_s17 + $0x10] sm:$0xff]  ;;  %4607 = vmatprep.subr.bf16.mxu1 %v4978_v9  ;;  %4629 = vmatprep.subr.bf16.mxu0 %v4981_v22 }
  0x13   : > { %2723 = vst.msk [vmem:[#allocation3 + $0x10] sm:$0xff] %vm553_vm0, %v5050_v3  ;;  %2724 = vst.msk [vmem:[#allocation3 + $0x18] sm:$0xff] %vm553_vm0, %v5050_v3  ;;  %v532_v13 = vpack.c.bf16 %v5197_v11, %v524_v10  ;;  %v5204_v14 = vld [vmem:[%s5193_s17 + $0x18] sm:$0xff]  ;;  %v5207_v15 = vld [vmem:[%s5193_s17 + $0x20] sm:$0xff]  ;;  %4630 = vmatpush3.bf16.msra.mxu0 %v4981_v22 }
  0x14   : > { %2725 = vst.msk [vmem:[#allocation3 + $0x20] sm:$0xff] %vm553_vm0, %v5050_v3  ;;  %2726 = vst.msk [vmem:[#allocation3 + $0x28] sm:$0xff] %vm553_vm0, %v5050_v3  ;;  %v5213_v17 = vld [vmem:[%s5193_s17 + $0x28] sm:$0xff]  ;;  %v5216_v18 = vld [vmem:[%s5193_s17 + $0x30] sm:$0xff]  ;;  %v5224_v20 = vpack.c.bf16 %v5207_v15, %v5204_v14  ;;  %4608 = vmatpush3.bf16.msra.mxu1 %v4978_v9  ;;  %v1012_v38 = vpack.c.bf16 %v5204_v14, %v5197_v11 }
  0x15   : > { %2727 = vst.msk [vmem:[#allocation3 + $0x30] sm:$0xff] %vm553_vm0, %v5050_v3  ;;  %2728 = vst.msk [vmem:[#allocation3 + $0x38] sm:$0xff] %vm553_vm0, %v5050_v3  ;;  %735 = vperm.xlu1 %4976, %v453_v6   ;;  %730 = vperm.xlu0 %4975, %v452_v7   ;;  %v5228_v21 = vpack.c.bf16 %v5216_v18, %v5213_v17  ;;  %v449_v23 = vld [vmem:[%s6209_s1 + $0x28] sm:$0xff]  ;;  %v4982_v26 = vld [vmem:[%s6211_s3 + $0x20] sm:$0xff]   ;;  %v1013_v39 = vpack.c.bf16 %v5213_v17, %v5207_v15 }
  0x16   : > { %2729 = vst.msk [vmem:[#allocation3 + $0x40] sm:$0xff] %vm553_vm0, %v5050_v3  ;;  %2730 = vst.msk [vmem:[#allocation3 + $0x48] sm:$0xff] %vm553_vm0, %v5050_v3  ;;  %4609 = vmatprep.mubr.msk.bf16.mxu1 %vm553_vm0, %v532_v13  ;;  %4617 = vmatprep.subr.bf16.mxu1 %v4979_v19  ;;  %v5248_v27 = vld [vmem:[%s5193_s17 + $0x38] sm:$0xff]  ;;  %v5253_v28 = vld [vmem:[%s5193_s17 + $0x40] sm:$0xff] }
  0x17   : > { %2731 = vst.msk [vmem:[#allocation3 + $0x50] sm:$0xff] %vm553_vm0, %v5050_v3  ;;  %2732 = vst.msk [vmem:[#allocation3 + $0x58] sm:$0xff] %vm553_vm0, %v5050_v3  ;;  %4610 = vmatmul.mubr.msk.bf16.vlgmr.msra.gmra.mxu1 %vm553_vm0, %v5224_v20  ;;  %v451_v29 = vld [vmem:[%s6209_s1 + $0x38] sm:$0xff]  ;;  %v450_v30 = vld [vmem:[%s6209_s1 + $0x30] sm:$0xff]  ;;  %4631 = vmatprep.subr.bf16.mxu0 %v4982_v26  ;;  %v5271_v33 = vpack.c.bf16 %v5253_v28, %v5248_v27  ;;  %v1014_v40 = vpack.c.bf16 %v5248_v27, %v5216_v18 }
  0x18   : > { %4613 = vmatprep.mubr.msk.bf16.mxu1 %vm553_vm0, %v5228_v21  ;;  %4618 = vmatpush3.bf16.msra.mxu1 %v4979_v19  ;;  %v4983_v31 = vld [vmem:[%s6211_s3 + $0x38] sm:$0xff]   ;;  %v5267_v32 = vld [vmem:[%s6211_s3 + $0x48] sm:$0xff]   ;;  %v456_v35 = vld [vmem:[%s6210_s2 + $0x20] sm:$0xff] }
  0x19   : > { %745 = vperm.xlu1 %4976, %v455_v12   ;;  %740 = vperm.xlu0 %4975, %v454_v16   ;;  %v457_v34 = vld [vmem:[%s6210_s2 + $0x28] sm:$0xff]  ;;  %v459_v36 = vld [vmem:[%s6210_s2 + $0x38] sm:$0xff]  ;;  %v458_v37 = vld [vmem:[%s6210_s2 + $0x30] sm:$0xff] }
  0x1a   : > { %4619 = vmatprep.subr.bf16.mxu1 %v4980_v25  ;;  %4632 = vmatpush3.bf16.msra.mxu0 %v4982_v26  ;;  %v5295_v41 = vld [vmem:[%s5193_s17 + $0x48] sm:$0xff]  ;;  %v5305_v46 = vld [vmem:[%s5193_s17 + $0x17] sm:$0xff]  ;;  %v5313_v50 = vld [vmem:[%s5193_s17 + $0x1f] sm:$0xff] }
  0x1b   : > { %4653 = vmatprep.subr.bf16.mxu0 %v5267_v32  ;;  %v1015_v42 = vpack.c.bf16 %v5295_v41, %v5253_v28  ;;  %v460_v45 = vld [vmem:[%s5193_s17 + $0x7] sm:$0xff]  ;;  %v461_v49 = vld [vmem:[%s5193_s17 + $0xf] sm:$0xff]  ;;  %v5342_v3 = vld [vmem:[%s5193_s17 + $0x19] sm:$0xff] }
  0x1c   : > { %4620 = vmatpush3.bf16.msra.mxu1 %v4980_v25  ;;  %v720_v55 = vld [vmem:[%s5193_s17 + $0x9] sm:$0xff]  ;;  %v5323_v56 = vld [vmem:[%s5193_s17 + $0x11] sm:$0xff]  ;;  %v5345_v4 = vld [vmem:[%s5193_s17 + $0x21] sm:$0xff] }
  0x1d   : > { %495 = vperm.xlu1 %4976, %v449_v23   ;;  %490 = vperm.xlu0 %4975, %v448_v24   ;;  %v4985_v61 = vld [vmem:[%s6211_s3 + $0x30] sm:$0xff]   ;;  %v4987_v5 = vld [vmem:[%s6211_s3 + $0x58] sm:$0xff]   ;;  %v4986_v9 = vld [vmem:[%s6211_s3 + $0x40] sm:$0xff]  }
  0x1e   : > { %4641 = vmatprep.subr.bf16.mxu1 %v4983_v31  ;;  %v5363_v13 = vld [vmem:[%s5193_s17 + $0x27] sm:$0xff]  ;;  %v5366_v16 = vld [vmem:[%s5193_s17 + $0x2f] sm:$0xff] }
  0x1f   : > { %4614 = vmatmul.mubr.msk.bf16.gmra.mxu1 %vm553_vm0, %v5271_v33  ;;  %v4988_v24 = vld [vmem:[%s6211_s3 + $0x68] sm:$0xff]   ;;  %v4990_v14 = vld [vmem:[%s6211_s3 + $0x60] sm:$0xff]  }
  0x20   : > { %v4992_v15 = vld [vmem:[%s6211_s3 + $0x88] sm:$0xff]  }
  0x21   : > { %505 = vperm.xlu1 %4976, %v451_v29   ;;  %500 = vperm.xlu0 %4975, %v450_v30   ;;  %v5382_v29 = vld [vmem:[%s5193_s17 + $0x37] sm:$0xff]  ;;  %v5385_v30 = vld [vmem:[%s5193_s17 + $0x3f] sm:$0xff] }
  0x25   : > { %755 = vperm.xlu1 %4976, %v457_v34   ;;  %750 = vperm.xlu0 %4975, %v456_v35  }
  0x29   : > { %765 = vperm.xlu1 %4976, %v459_v36   ;;  %760 = vperm.xlu0 %4975, %v458_v37  }
  0x88   : > { %v5299_v43 = vpop.permute.xlu1 %480  ;;  %v5301_v44 = vpop.permute.xlu0 %470 }
  0x89   : > { %6275 = vst [vmem:[#allocation4_spill] sm:$0xff] %v5299_v43  ;;  %6276 = vst [vmem:[#allocation5_spill] sm:$0xff] %v5301_v44  ;;  %v508_v51 = vmul.f32 %v5301_v44, %v460_v45  ;;  %v510_v53 = vmul.f32 %v5299_v43, %v5305_v46  ;;  %v890_v35 = vmul.f32 %v5301_v44, %v461_v49 }
  0x8a   : > { %v1248_v27 = vmul.f32 %v5301_v44, %v5305_v46 }
  0x8c   : > { %v5307_v47 = vpop.permute.xlu1 %485  ;;  %v5309_v48 = vpop.permute.xlu0 %475 }
  0x8d   : > { %6277 = vst [vmem:[#allocation6_spill] sm:$0xff] %v5307_v47  ;;  %6278 = vst [vmem:[#allocation7_spill] sm:$0xff] %v5309_v48  ;;  %v509_v52 = vmul.f32 %v5309_v48, %v461_v49  ;;  %v511_v54 = vmul.f32 %v5307_v47, %v5313_v50  ;;  %v1249_v18 = vmul.f32 %v5309_v48, %v5313_v50 }
  0x8f   : > { %v516_v57 = vpack.c.bf16 %v509_v52, %v508_v51  ;;  %v517_v58 = vpack.c.bf16 %v511_v54, %v510_v53  ;;  %v5400_v52 = vld [vmem:[%s5193_s17 + $0x29] sm:$0xff]  ;;  %v5403_v53 = vld [vmem:[%s5193_s17 + $0x31] sm:$0xff] }
  0x90   : > { %v5325_v59 = vpop.permute.xlu1 %735  ;;  %v5327_v60 = vpop.permute.xlu0 %730 }
  0x91   : > { %6279 = vst [vmem:[#allocation8_spill] sm:$0xff] %v5325_v59  ;;  %6280 = vst [vmem:[#allocation9_spill] sm:$0xff] %v5327_v60  ;;  %4621 = vmatprep.mubr.msk.bf16.mxu1 %vm553_vm0, %v516_v57  ;;  %v768_v62 = vmul.f32 %v5327_v60, %v720_v55  ;;  %v769_v63 = vmul.f32 %v5325_v59, %v5323_v56  ;;  %v893_v57 = vmul.f32 %v5307_v47, %v5363_v13 }
  0x92   : > { %4622 = vmatmul.mubr.msk.bf16.vlgmr.msra.gmra.mxu1 %vm553_vm0, %v517_v58 }
  0x93   : > { %v776_v0 = vpack.c.bf16 %v769_v63, %v768_v62  ;;  %4642 = vmatpush3.bf16.msra.mxu1 %v4983_v31  ;;  %v891_v31 = vmul.f32 %v5309_v48, %v5305_v46  ;;  %v5418_v62 = vld [vmem:[%s5193_s17 + $0x39] sm:$0xff]  ;;  %v5421_v63 = vld [vmem:[%s5193_s17 + $0x41] sm:$0xff] }
  0x94   : > { %v5337_v1 = vpop.permute.xlu1 %745  ;;  %v5339_v2 = vpop.permute.xlu0 %740  ;;  %4643 = vmatprep.subr.bf16.mxu1 %v4985_v61 }
  0x95   : > { %6281 = vst [vmem:[#allocation10_spill] sm:$0xff] %v5337_v1  ;;  %6282 = vst [vmem:[#allocation11_spill] sm:$0xff] %v5339_v2  ;;  %4633 = vmatprep.mubr.msk.bf16.mxu0 %vm553_vm0, %v776_v0  ;;  %v770_v6 = vmul.f32 %v5339_v2, %v5342_v3  ;;  %v771_v7 = vmul.f32 %v5337_v1, %v5345_v4  ;;  %v898_v51 = vpack.c.bf16 %v891_v31, %v890_v35 }
  0x97   : > { %v777_v8 = vpack.c.bf16 %v771_v7, %v770_v6  ;;  %4644 = vmatpush3.bf16.msra.mxu1 %v4985_v61 }
  0x98   : > { %v5358_v10 = vpop.permute.xlu1 %495  ;;  %v5360_v12 = vpop.permute.xlu0 %490  ;;  %4665 = vmatprep.subr.bf16.mxu1 %v4987_v5 }
  0x99   : > { %6283 = vst [vmem:[#allocation12_spill] sm:$0xff] %v5358_v10  ;;  %6284 = vst [vmem:[#allocation13_spill] sm:$0xff] %v5360_v12  ;;  %4634 = vmatmul.mubr.msk.bf16.vlgmr.msra.gmra.mxu0 %vm553_vm0, %v777_v8  ;;  %v512_v19 = vmul.f32 %v5360_v12, %v5363_v13  ;;  %v513_v22 = vmul.f32 %v5358_v10, %v5366_v16  ;;  %v894_v0 = vmul.f32 %v5360_v12, %v5366_v16 }
  0x9a   : > { %4654 = vmatpush3.bf16.msra.mxu0 %v5267_v32  ;;  %v895_v6 = vmul.f32 %v5358_v10, %v5382_v29  ;;  %v1252_v28 = vmul.f32 %v5360_v12, %v5382_v29 }
  0x9b   : > { %v518_v23 = vpack.c.bf16 %v513_v22, %v512_v19  ;;  %4655 = vmatprep.subr.bf16.mxu0 %v4986_v9 }
  0x9c   : > { %v5377_v25 = vpop.permute.xlu1 %505  ;;  %v5379_v26 = vpop.permute.xlu0 %500  ;;  %v900_v31 = vpack.c.bf16 %v895_v6, %v894_v0  ;;  %v1251_v0 = vmul.f32 %v5307_v47, %v5366_v16  ;;  %v1250_v6 = vmul.f32 %v5299_v43, %v5363_v13 }
  0x9d   : > { %6285 = vst [vmem:[#allocation14_spill] sm:$0xff] %v5377_v25  ;;  %6286 = vst [vmem:[#allocation15_spill] sm:$0xff] %v5379_v26  ;;  %4625 = vmatprep.mubr.msk.bf16.mxu1 %vm553_vm0, %v518_v23  ;;  %v514_v32 = vmul.f32 %v5379_v26, %v5382_v29  ;;  %v515_v34 = vmul.f32 %v5377_v25, %v5385_v30  ;;  %v4989_v23 = vld [vmem:[%s6211_s3 + $0x50] sm:$0xff]   ;;  %v1484_v29 = vmul.f32 %v5327_v60, %v5342_v3 }
  0x9e   : > { %4656 = vmatpush3.bf16.msra.mxu0 %v4986_v9  ;;  %v892_v9 = vmul.f32 %v5299_v43, %v5313_v50 }
  0x9f   : > { %v519_v36 = vpack.c.bf16 %v515_v34, %v514_v32  ;;  %4677 = vmatprep.subr.bf16.mxu0 %v4988_v24  ;;  %v889_v32 = vld [vmem:[%s5193_s17 + $0x47] sm:$0xff]  ;;  %v896_v34 = vmul.f32 %v5379_v26, %v5385_v30 }
  0xa0   : > { %v5395_v37 = vpop.permute.xlu1 %755  ;;  %v5397_v45 = vpop.permute.xlu0 %750  ;;  %v899_v22 = vpack.c.bf16 %v893_v57, %v892_v9  ;;  %v897_v35 = vmul.f32 %v889_v32, %v5377_v25  ;;  %v4993_v57 = vld [vmem:[%s6211_s3 + $0x70] sm:$0xff]   ;;  %v4994_v9 = vld [vmem:[%s6211_s3 + $0x80] sm:$0xff]   ;;  %v1254_v13 = vmul.f32 %v889_v32, %v5379_v26 }
  0xa1   : > { %6287 = vst [vmem:[#allocation16_spill] sm:$0xff] %v5395_v37  ;;  %6288 = vst [vmem:[#allocation17_spill] sm:$0xff] %v5397_v45  ;;  %4626 = vmatmul.mubr.msk.bf16.gmra.mxu1 %vm553_vm0, %v519_v36  ;;  %v772_v54 = vmul.f32 %v5397_v45, %v5400_v52  ;;  %v773_v49 = vmul.f32 %v5395_v37, %v5403_v53  ;;  %v4991_v36 = vld [vmem:[%s6211_s3 + $0x78] sm:$0xff]   ;;  %v1130_v17 = vmul.f32 %v5397_v45, %v5403_v53 }
  0xa2   : > { %4645 = vmatprep.mubr.msk.bf16.mxu1 %vm553_vm0, %v898_v51  ;;  %v1126_v51 = vmul.f32 %v5327_v60, %v5323_v56  ;;  %v901_v11 = vpack.c.bf16 %v897_v35, %v896_v34  ;;  %v1128_v56 = vmul.f32 %v5339_v2, %v5345_v4  ;;  %v1488_v32 = vmul.f32 %v5397_v45, %v5418_v62 }
  0xa3   : > { %v778_v55 = vpack.c.bf16 %v773_v49, %v772_v54  ;;  %v1129_v54 = vmul.f32 %v5337_v1, %v5400_v52  ;;  %v1256_v49 = vpack.c.bf16 %v1249_v18, %v1248_v27  ;;  %v1489_v34 = vmul.f32 %v5395_v37, %v5421_v63 }
  0xa4   : > { %v5413_v58 = vpop.permute.xlu1 %765  ;;  %v5415_v61 = vpop.permute.xlu0 %760 }
  0xa5   : > { %6289 = vst [vmem:[#allocation18_spill] sm:$0xff] %v5413_v58  ;;  %6290 = vst [vmem:[#allocation19_spill] sm:$0xff] %v5415_v61  ;;  %4637 = vmatprep.mubr.msk.bf16.mxu0 %vm553_vm0, %v778_v55  ;;  %v774_v7 = vmul.f32 %v5415_v61, %v5418_v62  ;;  %v775_v8 = vmul.f32 %v5413_v58, %v5421_v63  ;;  %v1125_v55 = vld [vmem:[%s5193_s17 + $0x49] sm:$0xff]  ;;  %v1132_v46 = vmul.f32 %v5415_v61, %v5421_v63 }
  0xa6   : > { %v1133_v50 = vmul.f32 %v1125_v55, %v5413_v58  ;;  %v4996_v63 = vld [vmem:[%s6213_s5 + $0x10] sm:$0xff]  }
  0xa7   : > { %v779_v19 = vpack.c.bf16 %v775_v8, %v774_v7  ;;  %v1257_v8 = vpack.c.bf16 %v1251_v0, %v1250_v6 }
  0xa8   : > { %v1137_v7 = vpack.c.bf16 %v1133_v50, %v1132_v46 }
  0xa9   : > { %4638 = vmatmul.mubr.msk.bf16.gmra.mxu0 %vm553_vm0, %v779_v19  ;;  %4646 = vmatmul.mubr.msk.bf16.vlgmr.msra.gmra.mxu1 %vm553_vm0, %v899_v22  ;;  %v1247_v22 = vld [vmem:[%s5193_s17 + $0x4f] sm:$0xff] }
  0xaa   : > { %4649 = vmatprep.mubr.msk.bf16.mxu1 %vm553_vm0, %v900_v31  ;;  %4666 = vmatpush3.bf16.msra.mxu1 %v4987_v5  ;;  %v1127_v5 = vmul.f32 %v5325_v59, %v5342_v3  ;;  %v1255_v16 = vmul.f32 %v1247_v22, %v5377_v25  ;;  %v1486_v3 = vmul.f32 %v5339_v2, %v5400_v52 }
  0xab   : > { %4657 = vmatprep.mubr.msk.bf16.mxu0 %vm553_vm0, %v1012_v38  ;;  %4667 = vmatprep.subr.bf16.mxu1 %v4989_v23 }
  0xac   : > { %v1134_v38 = vpack.c.bf16 %v1127_v5, %v1126_v51  ;;  %v1483_v51 = vld [vmem:[%s5193_s17 + $0x51] sm:$0xff]  ;;  %v4998_v5 = vld [vmem:[%s6213_s5] sm:$0xff]  }
  0xad   : > { %v1491_v52 = vmul.f32 %v1483_v51, %v5413_v58 }
  0xae   : > { %4668 = vmatpush3.bf16.msra.mxu1 %v4989_v23  ;;  %v1259_v23 = vpack.c.bf16 %v1255_v16, %v1254_v13 }
  0xaf   : > { %4689 = vmatprep.subr.bf16.mxu1 %v4991_v36 }
  0xb1   : > { %4650 = vmatmul.mubr.msk.bf16.gmra.mxu1 %vm553_vm0, %v901_v11  ;;  %4658 = vmatmul.mubr.msk.bf16.vlgmr.msra.gmra.mxu0 %vm553_vm0, %v1013_v39  ;;  %v1131_v39 = vmul.f32 %v5395_v37, %v5418_v62  ;;  %v4997_v62 = vld [vmem:[%s6213_s5 + $0x8] sm:$0xff]  }
  0xb2   : > { %4678 = vmatpush3.bf16.msra.mxu0 %v4988_v24  ;;  %4669 = vmatprep.mubr.msk.bf16.mxu1 %vm553_vm0, %v1134_v38  ;;  %v5558_v11 = vld [vmem:[%s6213_s5 + $0x28] sm:$0xff]  }
  0xb3   : > { %4661 = vmatprep.mubr.msk.bf16.mxu0 %vm553_vm0, %v1014_v40  ;;  %4679 = vmatprep.subr.bf16.mxu0 %v4990_v14  ;;  %v1135_v40 = vpack.c.bf16 %v1129_v54, %v1128_v56  ;;  %v1136_v24 = vpack.c.bf16 %v1131_v39, %v1130_v17  ;;  %6291 = vst [vmem:[#allocation20_spill] sm:$0xff] %v5558_v11 }
  0xb6   : > { %4680 = vmatpush3.bf16.msra.mxu0 %v4990_v14  ;;  %v5564_v14 = vld [vmem:[%s6213_s5 + $0x38] sm:$0xff]  }
  0xb7   : > { %4701 = vmatprep.subr.bf16.mxu0 %v4992_v15  ;;  %6292 = vst [vmem:[#allocation21_spill] sm:$0xff] %v5564_v14 }
  0xb9   : > { %4662 = vmatmul.mubr.msk.bf16.gmra.mxu0 %vm553_vm0, %v1015_v42  ;;  %4670 = vmatmul.mubr.msk.bf16.vlgmr.msra.gmra.mxu1 %vm553_vm0, %v1135_v40  ;;  %v1253_v42 = vmul.f32 %v5358_v10, %v5385_v30  ;;  %v1485_v30 = vmul.f32 %v5325_v59, %v5345_v4  ;;  %v1487_v4 = vmul.f32 %v5337_v1, %v5403_v53 }
  0xba   : > { %4673 = vmatprep.mubr.msk.bf16.mxu1 %vm553_vm0, %v1136_v24  ;;  %4681 = vmatprep.mubr.msk.bf16.mxu0 %vm553_vm0, %v1256_v49 }
  0xbb   : > { %4690 = vmatpush3.bf16.msra.mxu1 %v4991_v36  ;;  %v1258_v19 = vpack.c.bf16 %v1253_v42, %v1252_v28  ;;  %v1492_v31 = vpack.c.bf16 %v1485_v30, %v1484_v29  ;;  %v1493_v35 = vpack.c.bf16 %v1487_v4, %v1486_v3  ;;  %v1494_v36 = vpack.c.bf16 %v1489_v34, %v1488_v32 }
  0xbc   : > { %4691 = vmatprep.subr.bf16.mxu1 %v4993_v57 }
  0xbf   : > { %4692 = vmatpush3.bf16.msra.mxu1 %v4993_v57 }
  0xc1   : > { %4674 = vmatmul.mubr.msk.bf16.gmra.mxu1 %vm553_vm0, %v1137_v7  ;;  %4682 = vmatmul.mubr.msk.bf16.vlgmr.msra.gmra.mxu0 %vm553_vm0, %v1257_v8 }
  0xc2   : > { %4702 = vmatpush3.bf16.msra.mxu0 %v4992_v15  ;;  %4685 = vmatprep.mubr.msk.bf16.mxu0 %vm553_vm0, %v1258_v19 }
  0xc3   : > { %4693 = vmatprep.mubr.msk.bf16.mxu1 %vm553_vm0, %v5224_v20  ;;  %4703 = vmatprep.subr.bf16.mxu0 %v4994_v9  ;;  %v1369_v20 = vld [vmem:[%s5193_s17 + $0x50] sm:$0xff] }
  0xc6   : > { %4704 = vmatpush3.bf16.msra.mxu0 %v4994_v9 }
  0xc7   : > { %4725 = vmatprep.subr.bf16.mxu0 %v4997_v62 }
  0xc9   : > { %4686 = vmatmul.mubr.msk.bf16.gmra.mxu0 %vm553_vm0, %v1259_v23  ;;  %4694 = vmatmul.mubr.msk.bf16.vlgmr.msra.gmra.mxu1 %vm553_vm0, %v5228_v21  ;;  %v1373_v21 = vpack.c.bf16 %v1369_v20, %v5295_v41  ;;  %v4995_v41 = vld [vmem:[%s6213_s5 + $0x18] sm:$0xff]  }
  0xca   : > { %4705 = vmatprep.mubr.msk.bf16.mxu0 %vm553_vm0, %v1492_v31  ;;  %4697 = vmatprep.mubr.msk.bf16.mxu1 %vm553_vm0, %v5271_v33  ;;  %v1490_v33 = vmul.f32 %v1125_v55, %v5415_v61 }
  0xcb   : > { %4713 = vmatprep.subr.bf16.mxu1 %v4995_v41 }
  0xcc   : > { %v1495_v53 = vpack.c.bf16 %v1491_v52, %v1490_v33  ;;  %4714 = vmatpush3.bf16.msra.mxu1 %v4995_v41 }
  0xcd   : > { %4715 = vmatprep.subr.bf16.mxu1 %v4996_v63 }
  0xd0   : > { %4716 = vmatpush3.bf16.msra.mxu1 %v4996_v63 }
  0xd1   : > { %4698 = vmatmul.mubr.msk.bf16.gmra.mxu1 %vm553_vm0, %v1373_v21  ;;  %4706 = vmatmul.mubr.msk.bf16.vlgmr.msra.gmra.mxu0 %vm553_vm0, %v1493_v35 }
  0xd2   : > { %4709 = vmatprep.mubr.msk.bf16.mxu0 %vm553_vm0, %v1494_v36  ;;  %4726 = vmatpush3.bf16.msra.mxu0 %v4997_v62 }
  0xd3   : > { %4727 = vmatprep.subr.bf16.mxu0 %v4998_v5  ;;  %4737 = vmatprep.subr.bf16.mxu1 %v5558_v11 }
  0xd6   : > { %4728 = vmatpush3.bf16.msra.mxu0 %v4998_v5 }
  0xd7   : > { %v4611_v38 = vpop.f32.mrf.mxu1  ;;  %4749 = vmatprep.subr.bf16.mxu0 %v5564_v14 }
  0xd9   : > { %4710 = vmatmul.mubr.msk.bf16.gmra.mxu0 %vm553_vm0, %v1495_v53  ;;  %v600_v56 = vpop.f32.mrf.mxu1 }
  0xdb   : > { %v4612_v54 = vpop.f32.mrf.mxu1 }
  0xdd   : > { %v603_v15 = vpop.f32.mrf.mxu1 }
  0xdf   : > { %v4615_v17 = vpop.f32.mrf.mxu1 }
  0xe1   : > { %v5567_v39 = vpop.f32.mrf.mxu1 }
  0xe3   : > { %v5569_v18 = vpop.f32.mrf.mxu1 }
  0xe5   : > { %v5571_v27 = vpop.f32.mrf.mxu1 }
 0x152   : > { %v4623_v40 = vpop.f32.mrf.mxu1 }
 0x153   : > { %v698_v45 = vadd.f32 %v4623_v40, %v4611_v38 }
 0x154   : > { %v689_v24 = vpop.f32.mrf.mxu1 }
 0x155   : > { %v690_v2 = vadd.f32 %v689_v24, %v600_v56 }
 0x156   : > { %v4624_v49 = vpop.f32.mrf.mxu1 }
 0x157   : > { %v701_v14 = vadd.f32 %v4624_v49, %v4612_v54 }
 0x158   : > { %v692_v57 = vpop.f32.mrf.mxu1 }
 0x159   : > { %v4635_v55 = vpop.f32.mrf.mxu0  ;;  %v693_v47 = vadd.f32 %v692_v57, %v603_v15 }
 0x15a   : > { %v876_v25 = vadd.f32 %v4635_v55, %v698_v45 }
 0x15b   : > { %v843_v46 = vpop.f32.mrf.mxu0 }
 0x15c   : > { %v874_v59 = vadd.f32 %v843_v46, %v690_v2 }
 0x15d   : > { %v4636_v0 = vpop.f32.mrf.mxu0 }
 0x15e   : > { %v877_v43 = vadd.f32 %v4636_v0, %v701_v14 }
 0x15f   : > { %v846_v6 = vpop.f32.mrf.mxu0 }
 0x160   : > { %v875_v40 = vadd.f32 %v846_v6, %v693_v47 }
 0x161   : > { %v4627_v50 = vpop.f32.mrf.mxu1 }
 0x163   : > { %v705_v28 = vpop.f32.mrf.mxu1 }
 0x164   : > { %v706_v45 = vadd.f32 %v705_v28, %v5567_v39 }
 0x165   : > { %v4628_v42 = vpop.f32.mrf.mxu1 }
 0x166   : > { %v717_v14 = vadd.f32 %v4628_v42, %v5569_v18  ;;  %v5603_v18 = vld [vmem:[%s6212_s4] ss:$0 sm:$0xff] }
 0x167   : > { %v5573_v7 = vpop.f32.mrf.mxu1 }
 0x169   : > { %v4639_v8 = vpop.f32.mrf.mxu0  ;;  %v4647_v9 = vpop.f32.mrf.mxu1 }
 0x16a   : > { %v998_v10 = vadd.f32 %v4647_v9, %v876_v25 }
 0x16b   : > { %v859_v19 = vpop.f32.mrf.mxu0  ;;  %v965_v22 = vpop.f32.mrf.mxu1 }
 0x16c   : > { %v996_v48 = vadd.f32 %v965_v22, %v874_v59  ;;  %v878_v59 = vadd.f32 %v859_v19, %v706_v45 }
 0x16d   : > { %v5575_v13 = vpop.f32.mrf.mxu0  ;;  %v4648_v16 = vpop.f32.mrf.mxu1 }
 0x16e   : > { %v881_v39 = vadd.f32 %v5575_v13, %v717_v14 }
 0x16f   : > { %v5577_v29 = vpop.f32.mrf.mxu0  ;;  %v968_v30 = vpop.f32.mrf.mxu1 }
 0x170   : > { %v997_v2 = vadd.f32 %v968_v30, %v875_v40 }
 0x171   : > { %v4651_v23 = vpop.f32.mrf.mxu1  ;;  %v4659_v31 = vpop.f32.mrf.mxu0 }
 0x172   : > { %v1112_v44 = vadd.f32 %v4659_v31, %v998_v10 }
 0x173   : > { %v981_v20 = vpop.f32.mrf.mxu1  ;;  %v1079_v3 = vpop.f32.mrf.mxu0 }
 0x175   : > { %v5579_v4 = vpop.f32.mrf.mxu1  ;;  %v4660_v32 = vpop.f32.mrf.mxu0 }
 0x177   : > { %v5581_v34 = vpop.f32.mrf.mxu1  ;;  %v1082_v21 = vpop.f32.mrf.mxu0 }
 0x178   : > { %v1111_v57 = vadd.f32 %v1082_v21, %v997_v2 }
 0x179   : > { %v4663_v35 = vpop.f32.mrf.mxu0  ;;  %v4671_v36 = vpop.f32.mrf.mxu1 }
 0x17a   : > { %v1234_v56 = vadd.f32 %v4671_v36, %v1112_v44  ;;  %v709_v44 = vadd.f32 %v5573_v7, %v5571_v27 }
 0x17b   : > { %v5583_v51 = vpop.f32.mrf.mxu0  ;;  %v1201_v33 = vpop.f32.mrf.mxu1 }
 0x17d   : > { %v5585_v52 = vpop.f32.mrf.mxu0  ;;  %v4672_v53 = vpop.f32.mrf.mxu1 }
 0x17e   : > { %6293 = vst [vmem:[#allocation22_spill] sm:$0xff] %v5585_v52  ;;  %v1110_v52 = vadd.f32 %v1079_v3, %v996_v48 }
 0x17f   : > { %v5587_v41 = vpop.f32.mrf.mxu0  ;;  %v1204_v62 = vpop.f32.mrf.mxu1 }
 0x180   : > { %6294 = vst [vmem:[#allocation23_spill] sm:$0xff] %v5587_v41  ;;  %v714_v41 = vadd.f32 %v4627_v50, %v4615_v17  ;;  %v1232_v49 = vadd.f32 %v1201_v33, %v1110_v52  ;;  %v1000_v50 = vadd.f32 %v981_v20, %v878_v59  ;;  %v1233_v42 = vadd.f32 %v1204_v62, %v1111_v57 }
 0x181   : > { %v4675_v63 = vpop.f32.mrf.mxu1  ;;  %v4683_v5 = vpop.f32.mrf.mxu0 }
 0x182   : > { %v880_v24 = vadd.f32 %v4639_v8, %v714_v41  ;;  %v1356_v46 = vadd.f32 %v4683_v5, %v1234_v56  ;;  %v1114_v27 = vadd.f32 %v5583_v51, %v1000_v50 }
 0x183   : > { %v5589_v58 = vpop.f32.mrf.mxu1  ;;  %v1323_v61 = vpop.f32.mrf.mxu0 }
 0x184   : > { %6295 = vst [vmem:[#allocation24_spill] sm:$0xff] %v5589_v58  ;;  %v1002_v10 = vadd.f32 %v4651_v23, %v880_v24 }
 0x185   : > { %v5591_v1 = vpop.f32.mrf.mxu1  ;;  %v4684_v37 = vpop.f32.mrf.mxu0  ;;  %v6297_v20 = vld [vmem:[#allocation22_spill] sm:$0xff] }
 0x186   : > { %6296 = vst [vmem:[#allocation25_spill] sm:$0xff] %v5591_v1  ;;  %v999_v1 = vadd.f32 %v4648_v16, %v877_v43  ;;  %v1354_v43 = vadd.f32 %v1323_v61, %v1232_v49  ;;  %v1116_v0 = vadd.f32 %v4663_v35, %v1002_v10  ;;  %v879_v61 = vadd.f32 %v5577_v29, %v709_v44 }
 0x187   : > { %v5593_v26 = vpop.f32.mrf.mxu1  ;;  %v1326_v60 = vpop.f32.mrf.mxu0  ;;  %v6299_v33 = vld [vmem:[#allocation23_spill] sm:$0xff] }
 0x188   : > { %v1113_v25 = vadd.f32 %v4660_v32, %v999_v1  ;;  %v1238_v7 = vadd.f32 %v4675_v63, %v1116_v0  ;;  %v1355_v13 = vadd.f32 %v1326_v60, %v1233_v42  ;;  %v1001_v31 = vadd.f32 %v5581_v34, %v879_v61  ;;  %v6301_v42 = vld [vmem:[#allocation5_spill] sm:$0xff] }
 0x189   : > { %v4687_v12 = vpop.f32.mrf.mxu0  ;;  %v4695_v11 = vpop.f32.mrf.mxu1 }
 0x18a   : > { %v1235_v47 = vadd.f32 %v4672_v53, %v1113_v25  ;;  %v1470_v48 = vadd.f32 %v4695_v11, %v1356_v46  ;;  %v1003_v11 = vadd.f32 %v5579_v4, %v881_v39  ;;  %v1360_v21 = vadd.f32 %v4687_v12, %v1238_v7 }
 0x18b   : > { %v1339_v58 = vpop.f32.mrf.mxu0  ;;  %v1437_v38 = vpop.f32.mrf.mxu1  ;;  %v6298_v3 = vld [vmem:[#allocation24_spill] sm:$0xff]  ;;  %v1115_v52 = vadd.f32 %v6299_v33, %v1001_v31 }
 0x18c   : > { %v1357_v6 = vadd.f32 %v4684_v37, %v1235_v47  ;;  %v1468_v8 = vadd.f32 %v1437_v38, %v1354_v43  ;;  %v1117_v37 = vadd.f32 %v6297_v20, %v1003_v11  ;;  %v1236_v32 = vadd.f32 %v6298_v3, %v1114_v27  ;;  %v6302_v11 = vld [vmem:[#allocation7_spill] sm:$0xff]  ;;  %v6304_v20 = vld [vmem:[#allocation6_spill] sm:$0xff]  ;;  %v5000_v3 = vld [vmem:[%s6213_s5 + $0x20] sm:$0xff]  }
 0x18d   : > { %v4688_v55 = vpop.f32.mrf.mxu0  ;;  %v4696_v54 = vpop.f32.mrf.mxu1  ;;  %v6300_v60 = vld [vmem:[#allocation25_spill] sm:$0xff]  ;;  %v1237_v40 = vadd.f32 %v5593_v26, %v1115_v52 }
 0x18e   : > { %v1471_v16 = vadd.f32 %v4696_v54, %v1357_v6  ;;  %v1239_v53 = vadd.f32 %v6300_v60, %v1117_v37  ;;  %v1358_v41 = vadd.f32 %v1339_v58, %v1236_v32  ;;  %v6306_v60 = vld [vmem:[#allocation13_spill] sm:$0xff] }
 0x18f   : > { %v1342_v15 = vpop.f32.mrf.mxu0  ;;  %v1440_v17 = vpop.f32.mrf.mxu1 }
 0x190   : > { %v1469_v35 = vadd.f32 %v1440_v17, %v1355_v13  ;;  %v1361_v56 = vadd.f32 %v4688_v55, %v1239_v53  ;;  %v1359_v25 = vadd.f32 %v1342_v15, %v1237_v40  ;;  %v1665_v15 = vld [vmem:[#allocation2 + $0x8] sm:$0xff] }
 0x191   : > { %v4699_v1 = vpop.f32.mrf.mxu1  ;;  %v4707_v28 = vpop.f32.mrf.mxu0 }
 0x192   : > { %v1592_v9 = vadd.f32 %v4707_v28, %v1470_v48  ;;  %v1474_v5 = vadd.f32 %v4699_v1, %v1360_v21  ;;  %v1641_v48 = vld [vmem:[#allocation2 + $0x7] sm:$0xff] }
 0x193   : > { %v1453_v19 = vpop.f32.mrf.mxu1  ;;  %v1559_v22 = vpop.f32.mrf.mxu0  ;;  %v1649_v6 = vmul.f32 %v1641_v48, %v6301_v42 }
 0x194   : > { %v1607_v30 = vadd.f32 %v5603_v18, %v1592_v9  ;;  %v1590_v23 = vadd.f32 %v1559_v22, %v1468_v8  ;;  %v1472_v24 = vadd.f32 %v1453_v19, %v1358_v41  ;;  %v6307_v41 = vld [vmem:[#allocation12_spill] sm:$0xff] }
 0x195   : > { %v4708_v29 = vpop.f32.mrf.mxu0  ;;  %v4700_v62 = vpop.f32.mrf.mxu1 }
 0x196   : > { %v1615_v4 = vmax.f32 %v1607_v30, 0.0  ;;  %v1605_v36 = vadd.f32 %v5603_v18, %v1590_v23  ;;  %v1593_v51 = vadd.f32 %v4708_v29, %v1471_v16  ;;  %v1475_v14 = vadd.f32 %v4700_v62, %v1361_v56  ;;  %v6303_v23 = vld [vmem:[#allocation4_spill] sm:$0xff] }
 0x197   : > { %v1562_v63 = vpop.f32.mrf.mxu0  ;;  %v1456_v49 = vpop.f32.mrf.mxu1 }
 0x198   : > { %1635 = vst.msk [vmem:[#allocation2 + $0x20] sm:$0xff] %vm553_vm0, %v1615_v4  ;;  %v1613_v34 = vmax.f32 %v1605_v36, 0.0  ;;  %v1608_v38 = vadd.f32 %v5603_v18, %v1593_v51  ;;  %v1591_v12 = vadd.f32 %v1562_v63, %v1469_v35  ;;  %v1473_v55 = vadd.f32 %v1456_v49, %v1359_v25  ;;  %v5002_v35 = vld [vmem:[%s6213_s5 + $0x30] sm:$0xff]   ;;  %v6305_v4 = vld [vmem:[#allocation20_spill] sm:$0xff] }
 0x199   : > { %v4711_v45 = vpop.f32.mrf.mxu0 }
 0x19a   : > { %1633 = vst.msk [vmem:[#allocation2 + $0x10] sm:$0xff] %vm553_vm0, %v1613_v34  ;;  %v1616_v54 = vmax.f32 %v1608_v38, 0.0  ;;  %v1606_v2 = vadd.f32 %v5603_v18, %v1591_v12  ;;  %v1596_v58 = vadd.f32 %v4711_v45, %v1474_v5  ;;  %v5003_v5 = vld [vmem:[%s6213_s5 + $0x48] sm:$0xff]   ;;  %v6308_v34 = vld [vmem:[#allocation8_spill] sm:$0xff]  ;;  %v5005_v45 = vld [vmem:[%s6213_s5 + $0x58] sm:$0xff]  }
 0x19b   : > { %v1575_v46 = vpop.f32.mrf.mxu0  ;;  %v6309_v12 = vld [vmem:[#allocation21_spill] sm:$0xff] }
 0x19c   : > { %1636 = vst.msk [vmem:[#allocation2 + $0x28] sm:$0xff] %vm553_vm0, %v1616_v54  ;;  %v1614_v59 = vmax.f32 %v1606_v2, 0.0  ;;  %v1611_v10 = vadd.f32 %v5603_v18, %v1596_v58  ;;  %v1594_v17 = vadd.f32 %v1575_v46, %v1472_v24  ;;  %v6310_v54 = vld [vmem:[#allocation9_spill] sm:$0xff] }
 0x19d   : > { %v4712_v26 = vpop.f32.mrf.mxu0 }
 0x19e   : > { %1634 = vst.msk [vmem:[#allocation2 + $0x18] sm:$0xff] %vm553_vm0, %v1614_v59  ;;  %v1619_v57 = vmax.f32 %v1611_v10, 0.0  ;;  %v1609_v47 = vadd.f32 %v5603_v18, %v1594_v17  ;;  %v1597_v43 = vadd.f32 %v4712_v26, %v1475_v14  ;;  %v6311_v14 = vld [vmem:[#allocation15_spill] sm:$0xff]  ;;  %v6312_v10 = vld [vmem:[#allocation14_spill] sm:$0xff] }
 0x19f   : > { %v1578_v44 = vpop.f32.mrf.mxu0  ;;  %v5635_v22 = vld [vmem:[#allocation2 + $0x20] sm:$0xff] }
 0x1a0   : > { %1639 = vst.msk [vmem:[#allocation2 + $0x40] sm:$0xff] %vm553_vm0, %v1619_v57  ;;  %v1617_v39 = vmax.f32 %v1609_v47, 0.0  ;;  %v1612_v50 = vadd.f32 %v5603_v18, %v1597_v43  ;;  %v1595_v0 = vadd.f32 %v1578_v44, %v1473_v55 }
 0x1a1   : > { %v5626_v1 = vld [vmem:[#allocation2 + $0x10] sm:$0xff] }
 0x1a2   : > { %v1642_v28 = vld [vmem:[#allocation2 + $0xf] sm:$0xff]  ;;  %1637 = vst.msk [vmem:[#allocation2 + $0x30] sm:$0xff] %vm553_vm0, %v1617_v39  ;;  %v1620_v8 = vmax.f32 %v1612_v50, 0.0  ;;  %v1610_v9 = vadd.f32 %v5603_v18, %v1595_v0  ;;  %v1673_v61 = vpack.c.bf16 %v5626_v1, %v1665_v15  ;;  %v6313_v15 = vld [vmem:[#allocation11_spill] sm:$0xff]  ;;  %v6314_v0 = vld [vmem:[#allocation16_spill] sm:$0xff] }
 0x1a3   : > { %v1650_v27 = vmul.f32 %v1642_v28, %v6302_v11  ;;  %v5656_v32 = vld [vmem:[#allocation2 + $0x27] sm:$0xff]  ;;  %v1990_v55 = vmul.f32 %v1642_v28, %v6301_v42 }
 0x1a4   : > { %1640 = vst.msk [vmem:[#allocation2 + $0x48] sm:$0xff] %vm553_vm0, %v1620_v8  ;;  %v1618_v7 = vmax.f32 %v1610_v9, 0.0  ;;  %4717 = vmatprep.mubr.msk.bf16.mxu1 %vm553_vm0, %v1673_v61  ;;  %v5666_v36 = vld [vmem:[#allocation2 + $0x28] sm:$0xff]  ;;  %v1653_v53 = vmul.f32 %v5656_v32, %v6306_v60 }
 0x1a5   : > { %v1657_v19 = vpack.c.bf16 %v1650_v27, %v1649_v6  ;;  %v5637_v13 = vld [vmem:[#allocation2 + $0x18] sm:$0xff]  ;;  %v1860_v63 = vld [vmem:[#allocation2 + $0x9] sm:$0xff]  ;;  %v5720_v44 = vld [vmem:[#allocation2 + $0x21] sm:$0xff] }
 0x1a6   : > { %v5639_v16 = vld [vmem:[#allocation2 + $0x17] sm:$0xff]  ;;  %v5641_v30 = vld [vmem:[#allocation2 + $0x1f] sm:$0xff]  ;;  %1638 = vst.msk [vmem:[#allocation2 + $0x38] sm:$0xff] %vm553_vm0, %v1618_v7  ;;  %v5647_v18 = vpack.c.bf16 %v5635_v22, %v5637_v13  ;;  %v1868_v2 = vmul.f32 %v1860_v63, %v6310_v54  ;;  %v6316_v61 = vld [vmem:[#allocation17_spill] sm:$0xff] }
 0x1a7   : > { %4729 = vmatprep.mubr.msk.bf16.mxu0 %vm553_vm0, %v1657_v19  ;;  %v1651_v31 = vmul.f32 %v5639_v16, %v6303_v23  ;;  %v1652_v37 = vmul.f32 %v5641_v30, %v6304_v20  ;;  %v5660_v29 = vld [vmem:[#allocation2 + $0x11] sm:$0xff]  ;;  %v5689_v56 = vld [vmem:[#allocation2 + $0x40] sm:$0xff]  ;;  %v1991_v49 = vmul.f32 %v5639_v16, %v6302_v11  ;;  %v1992_v9 = vmul.f32 %v5641_v30, %v6303_v23 }
 0x1a8   : > { %4718 = vmatmul.mubr.msk.bf16.vlgmr.msra.gmra.mxu1 %vm553_vm0, %v5647_v18  ;;  %v1869_v38 = vmul.f32 %v5660_v29, %v6308_v34  ;;  %v5713_v57 = vld [vmem:[#allocation2 + $0x19] sm:$0xff]  ;;  %v6315_v6 = vld [vmem:[#allocation10_spill] sm:$0xff] }
 0x1a9   : > { %v1658_v21 = vpack.c.bf16 %v1652_v37, %v1651_v31  ;;  %4738 = vmatpush3.bf16.msra.mxu1 %v6305_v4  ;;  %v5668_v51 = vld [vmem:[#allocation2 + $0x30] sm:$0xff]  ;;  %v1998_v48 = vpack.c.bf16 %v1991_v49, %v1990_v55  ;;  %v1870_v39 = vmul.f32 %v5713_v57, %v6313_v15  ;;  %v1871_v8 = vmul.f32 %v5720_v44, %v6315_v6  ;;  %v5004_v37 = vld [vmem:[%s6213_s5 + $0x40] sm:$0xff]  }
 0x1aa   : > { %v5670_v33 = vld [vmem:[#allocation2 + $0x2f] sm:$0xff]  ;;  %v5675_v52 = vpack.c.bf16 %v5668_v51, %v5666_v36  ;;  %4739 = vmatprep.subr.bf16.mxu1 %v5000_v3  ;;  %v1876_v26 = vpack.c.bf16 %v1869_v38, %v1868_v2  ;;  %v1993_v31 = vmul.f32 %v5656_v32, %v6304_v20  ;;  %v6317_v38 = vld [vmem:[#allocation19_spill] sm:$0xff]  ;;  %v2227_v55 = vmul.f32 %v5713_v57, %v6308_v34 }
 0x1ab   : > { %4730 = vmatmul.mubr.msk.bf16.vlgmr.msra.gmra.mxu0 %vm553_vm0, %v1658_v21  ;;  %v1654_v62 = vmul.f32 %v5670_v33, %v6307_v41  ;;  %v5725_v50 = vld [vmem:[#allocation2 + $0x29] sm:$0xff]  ;;  %v1877_v19 = vpack.c.bf16 %v1871_v8, %v1870_v39  ;;  %v1994_v21 = vmul.f32 %v5670_v33, %v6306_v60  ;;  %v5752_v63 = vld [vmem:[#allocation2 + $0x41] sm:$0xff] }
 0x1ac   : > { %4750 = vmatpush3.bf16.msra.mxu0 %v6309_v12  ;;  %4721 = vmatprep.mubr.msk.bf16.mxu1 %vm553_vm0, %v5675_v52  ;;  %v1872_v27 = vmul.f32 %v5725_v50, %v6316_v61  ;;  %v1999_v4 = vpack.c.bf16 %v1993_v31, %v1992_v9  ;;  %v5761_v2 = vld [vmem:[#allocation2 + $0x47] sm:$0xff]  ;;  %v2228_v9 = vmul.f32 %v5720_v44, %v6313_v15  ;;  %v5010_v31 = vld [vmem:[%s6213_s5 + $0x70] sm:$0xff]  }
 0x1ad   : > { %v1659_v40 = vpack.c.bf16 %v1654_v62, %v1653_v53  ;;  %4751 = vmatprep.subr.bf16.mxu0 %v5002_v35  ;;  %v5694_v24 = vld [vmem:[#allocation2 + $0x38] sm:$0xff]  ;;  %4740 = vmatpush3.bf16.msra.mxu1 %v5000_v3  ;;  %v5006_v53 = vld [vmem:[%s6213_s5 + $0x50] sm:$0xff]  }
 0x1ae   : > { %v5697_v58 = vld [vmem:[#allocation2 + $0x37] sm:$0xff]  ;;  %v5699_v25 = vld [vmem:[#allocation2 + $0x3f] sm:$0xff]  ;;  %v5706_v46 = vpack.c.bf16 %v5689_v56, %v5694_v24  ;;  %4761 = vmatprep.subr.bf16.mxu1 %v5003_v5 }
 0x1af   : > { %4733 = vmatprep.mubr.msk.bf16.mxu0 %vm553_vm0, %v1659_v40  ;;  %v1655_v59 = vmul.f32 %v5697_v58, %v6311_v14  ;;  %v1656_v17 = vmul.f32 %v5699_v25, %v6312_v10  ;;  %v5717_v43 = vld [vmem:[#allocation2 + $0x31] sm:$0xff]  ;;  %v1995_v7 = vmul.f32 %v5697_v58, %v6307_v41  ;;  %v5007_v40 = vld [vmem:[%s6213_s5 + $0x68] sm:$0xff]  }
 0x1b0   : > { %4752 = vmatpush3.bf16.msra.mxu0 %v5002_v35  ;;  %4722 = vmatmul.mubr.msk.bf16.gmra.mxu1 %vm553_vm0, %v5706_v46  ;;  %v1873_v28 = vmul.f32 %v5717_v43, %v6314_v0  ;;  %v5745_v35 = vld [vmem:[#allocation2 + $0x39] sm:$0xff]  ;;  %v2230_v8 = vmul.f32 %v5717_v43, %v6316_v61 }
 0x1b1   : > { %v1660_v47 = vpack.c.bf16 %v1656_v17, %v1655_v59  ;;  %4773 = vmatprep.subr.bf16.mxu0 %v5005_v45  ;;  %4741 = vmatprep.mubr.msk.bf16.mxu1 %vm553_vm0, %v1876_v26  ;;  %v2000_v62 = vpack.c.bf16 %v1995_v7, %v1994_v21  ;;  %v1874_v12 = vmul.f32 %v5745_v35, %v6317_v38  ;;  %v5009_v17 = vld [vmem:[%s6213_s5 + $0x78] sm:$0xff]  }
 0x1b2   : > { %v1878_v3 = vpack.c.bf16 %v1873_v28, %v1872_v27  ;;  %v1996_v59 = vmul.f32 %v5699_v25, %v6311_v14  ;;  %v2226_v26 = vmul.f32 %v5660_v29, %v6310_v54  ;;  %v2229_v29 = vmul.f32 %v5725_v50, %v6315_v6  ;;  %v5008_v27 = vld [vmem:[%s6213_s5 + $0x60] sm:$0xff]  }
 0x1b3   : > { %4734 = vmatmul.mubr.msk.bf16.gmra.mxu0 %vm553_vm0, %v1660_v47  ;;  %v2114_v7 = vpack.c.bf16 %v5694_v24, %v5668_v51  ;;  %v2111_v51 = vld [vmem:[#allocation2 + $0x48] sm:$0xff]  ;;  %v2348_v24 = vmul.f32 %v5639_v16, %v6301_v42  ;;  %v2232_v21 = vmul.f32 %v5752_v63, %v6317_v38  ;;  %v2351_v16 = vmul.f32 %v5670_v33, %v6304_v20 }
 0x1b4   : > { %4753 = vmatprep.mubr.msk.bf16.mxu0 %vm553_vm0, %v1998_v48  ;;  %v2112_v48 = vpack.c.bf16 %v5637_v13, %v5626_v1  ;;  %v2234_v28 = vpack.c.bf16 %v2227_v55, %v2226_v26  ;;  %v2231_v1 = vmul.f32 %v5745_v35, %v6314_v0  ;;  %v2113_v13 = vpack.c.bf16 %v5666_v36, %v5635_v22  ;;  %v2225_v36 = vld [vmem:[#allocation2 + $0x49] sm:$0xff] }
 0x1b5   : > { %v2347_v26 = vld [vmem:[#allocation2 + $0x4f] sm:$0xff]  ;;  %v2584_v33 = vmul.f32 %v5713_v57, %v6310_v54  ;;  %v2588_v57 = vmul.f32 %v5745_v35, %v6316_v61 }
 0x1b6   : > { %v2236_v22 = vpack.c.bf16 %v2231_v1, %v2230_v8  ;;  %v5014_v35 = vld [vmem:[%s6215_s7 + $0x10] sm:$0xff]   ;;  %v5016_v8 = vld [vmem:[%s6215_s7] sm:$0xff]   ;;  %v5875_v1 = vld [vmem:[%s6215_s7 + $0x28] sm:$0xff]  }
 0x1b7   : > { %6319 = vst [vmem:[#allocation22_spill] sm:$0xff] %v5875_v1 }
 0x1b8   : > { %4742 = vmatmul.mubr.msk.bf16.vlgmr.msra.gmra.mxu1 %vm553_vm0, %v1877_v19  ;;  %v2235_v19 = vpack.c.bf16 %v2229_v29, %v2228_v9 }
 0x1b9   : > { %4762 = vmatpush3.bf16.msra.mxu1 %v5003_v5  ;;  %4745 = vmatprep.mubr.msk.bf16.mxu1 %vm553_vm0, %v1878_v3  ;;  %v6318_v5 = vld [vmem:[#allocation18_spill] sm:$0xff]  ;;  %v2349_v3 = vmul.f32 %v5641_v30, %v6302_v11  ;;  %v2352_v30 = vmul.f32 %v5697_v58, %v6306_v60  ;;  %v2585_v58 = vmul.f32 %v5720_v44, %v6308_v34 }
 0x1ba   : > { %4763 = vmatprep.subr.bf16.mxu1 %v5004_v37  ;;  %v1875_v49 = vmul.f32 %v5752_v63, %v6318_v5  ;;  %v2589_v44 = vmul.f32 %v5752_v63, %v6314_v0  ;;  %v5015_v63 = vld [vmem:[%s6215_s7 + $0x8] sm:$0xff]  }
 0x1bb   : > { %4754 = vmatmul.mubr.msk.bf16.vlgmr.msra.gmra.mxu0 %vm553_vm0, %v1999_v4  ;;  %v2233_v4 = vmul.f32 %v2225_v36, %v6318_v5 }
 0x1bc   : > { %4757 = vmatprep.mubr.msk.bf16.mxu0 %vm553_vm0, %v2000_v62  ;;  %4774 = vmatpush3.bf16.msra.mxu0 %v5005_v45  ;;  %v1879_v47 = vpack.c.bf16 %v1875_v49, %v1874_v12  ;;  %v1997_v45 = vmul.f32 %v5761_v2, %v6312_v10  ;;  %v2356_v62 = vpack.c.bf16 %v2349_v3, %v2348_v24 }
 0x1bd   : > { %4775 = vmatprep.subr.bf16.mxu0 %v5006_v53  ;;  %4764 = vmatpush3.bf16.msra.mxu1 %v5004_v37  ;;  %v5011_v37 = vld [vmem:[%s6213_s5 + $0x88] sm:$0xff]   ;;  %v2237_v12 = vpack.c.bf16 %v2233_v4, %v2232_v21 }
 0x1be   : > { %4785 = vmatprep.subr.bf16.mxu1 %v5007_v40  ;;  %v2001_v39 = vpack.c.bf16 %v1997_v45, %v1996_v59  ;;  %v5012_v59 = vld [vmem:[%s6213_s5 + $0x80] sm:$0xff]  }
 0x1c0   : > { %4776 = vmatpush3.bf16.msra.mxu0 %v5006_v53  ;;  %4746 = vmatmul.mubr.msk.bf16.gmra.mxu1 %vm553_vm0, %v1879_v47  ;;  %v2115_v53 = vpack.c.bf16 %v2111_v51, %v5689_v56  ;;  %v2353_v56 = vmul.f32 %v5699_v25, %v6307_v41  ;;  %v2469_v25 = vld [vmem:[#allocation2 + $0x50] sm:$0xff]  ;;  %v2592_v47 = vpack.c.bf16 %v2585_v58, %v2584_v33 }
 0x1c1   : > { %4797 = vmatprep.subr.bf16.mxu0 %v5009_v17  ;;  %4765 = vmatprep.mubr.msk.bf16.mxu1 %vm553_vm0, %v2112_v48  ;;  %v2594_v48 = vpack.c.bf16 %v2589_v44, %v2588_v57 }
 0x1c3   : > { %4758 = vmatmul.mubr.msk.bf16.gmra.mxu0 %vm553_vm0, %v2001_v39  ;;  %v2583_v39 = vld [vmem:[#allocation2 + $0x51] sm:$0xff] }
 0x1c4   : > { %4777 = vmatprep.mubr.msk.bf16.mxu0 %vm553_vm0, %v2234_v28  ;;  %v2590_v28 = vmul.f32 %v2225_v36, %v6317_v38 }
 0x1c8   : > { %4766 = vmatmul.mubr.msk.bf16.vlgmr.msra.gmra.mxu1 %vm553_vm0, %v2113_v13  ;;  %v5881_v13 = vld [vmem:[%s6215_s7 + $0x38] sm:$0xff]  }
 0x1c9   : > { %4786 = vmatpush3.bf16.msra.mxu1 %v5007_v40  ;;  %4769 = vmatprep.mubr.msk.bf16.mxu1 %vm553_vm0, %v2114_v7  ;;  %v2350_v40 = vmul.f32 %v5656_v32, %v6303_v23  ;;  %v2355_v32 = vmul.f32 %v2347_v26, %v6312_v10  ;;  %6320 = vst [vmem:[#allocation24_spill] sm:$0xff] %v5881_v13 }
 0x1ca   : > { %4787 = vmatprep.subr.bf16.mxu1 %v5008_v27 }
 0x1cb   : > { %4778 = vmatmul.mubr.msk.bf16.vlgmr.msra.gmra.mxu0 %vm553_vm0, %v2235_v19  ;;  %v2357_v49 = vpack.c.bf16 %v2351_v16, %v2350_v40 }
 0x1cc   : > { %4781 = vmatprep.mubr.msk.bf16.mxu0 %vm553_vm0, %v2236_v22  ;;  %4798 = vmatpush3.bf16.msra.mxu0 %v5009_v17  ;;  %v2358_v17 = vpack.c.bf16 %v2353_v56, %v2352_v30 }
 0x1cd   : > { %4799 = vmatprep.subr.bf16.mxu0 %v5010_v31  ;;  %4788 = vmatpush3.bf16.msra.mxu1 %v5008_v27 }
 0x1ce   : > { %4809 = vmatprep.subr.bf16.mxu1 %v5011_v37 }
 0x1d0   : > { %4800 = vmatpush3.bf16.msra.mxu0 %v5010_v31  ;;  %4770 = vmatmul.mubr.msk.bf16.gmra.mxu1 %vm553_vm0, %v2115_v53 }
 0x1d1   : > { %4789 = vmatprep.mubr.msk.bf16.mxu1 %vm553_vm0, %v2356_v62 }
 0x1d3   : > { %4782 = vmatmul.mubr.msk.bf16.gmra.mxu0 %vm553_vm0, %v2237_v12 }
 0x1d4   : > { %4801 = vmatprep.mubr.msk.bf16.mxu0 %vm553_vm0, %v5647_v18  ;;  %v2354_v18 = vmul.f32 %v5761_v2, %v6311_v14  ;;  %v2586_v2 = vmul.f32 %v5725_v50, %v6313_v15  ;;  %v5013_v50 = vld [vmem:[%s6215_s7 + $0x18] sm:$0xff]  }
 0x1d5   : > { %4821 = vmatprep.subr.bf16.mxu0 %v5013_v50 }
 0x1d6   : > { %v2359_v55 = vpack.c.bf16 %v2355_v32, %v2354_v18 }
 0x1d8   : > { %4790 = vmatmul.mubr.msk.bf16.vlgmr.msra.gmra.mxu1 %vm553_vm0, %v2357_v49 }
 0x1d9   : > { %4810 = vmatpush3.bf16.msra.mxu1 %v5011_v37  ;;  %4793 = vmatprep.mubr.msk.bf16.mxu1 %vm553_vm0, %v2358_v17 }
 0x1da   : > { %4811 = vmatprep.subr.bf16.mxu1 %v5012_v59 }
 0x1db   : > { %4802 = vmatmul.mubr.msk.bf16.vlgmr.msra.gmra.mxu0 %vm553_vm0, %v5675_v52  ;;  %v2473_v52 = vpack.c.bf16 %v2469_v25, %v2111_v51 }
 0x1dc   : > { %4805 = vmatprep.mubr.msk.bf16.mxu0 %vm553_vm0, %v5706_v46  ;;  %v2587_v46 = vmul.f32 %v5717_v43, %v6315_v6  ;;  %v2591_v43 = vmul.f32 %v2583_v39, %v6318_v5  ;;  %4822 = vmatpush3.bf16.msra.mxu0 %v5013_v50 }
 0x1dd   : > { %4812 = vmatpush3.bf16.msra.mxu1 %v5012_v59  ;;  %4823 = vmatprep.subr.bf16.mxu0 %v5014_v35 }
 0x1de   : > { %v2593_v45 = vpack.c.bf16 %v2587_v46, %v2586_v2  ;;  %v2595_v29 = vpack.c.bf16 %v2591_v43, %v2590_v28  ;;  %4833 = vmatprep.subr.bf16.mxu1 %v5015_v63 }
 0x1e0   : > { %4794 = vmatmul.mubr.msk.bf16.gmra.mxu1 %vm553_vm0, %v2359_v55  ;;  %4824 = vmatpush3.bf16.msra.mxu0 %v5014_v35 }
 0x1e1   : > { %4813 = vmatprep.mubr.msk.bf16.mxu1 %vm553_vm0, %v2592_v47  ;;  %4845 = vmatprep.subr.bf16.mxu0 %v5875_v1 }
 0x1e3   : > { %4806 = vmatmul.mubr.msk.bf16.gmra.mxu0 %vm553_vm0, %v2473_v52 }
 0x1e8   : > { %4814 = vmatmul.mubr.msk.bf16.vlgmr.msra.gmra.mxu1 %vm553_vm0, %v2593_v45 }
 0x1e9   : > { %4817 = vmatprep.mubr.msk.bf16.mxu1 %vm553_vm0, %v2594_v48  ;;  %4834 = vmatpush3.bf16.msra.mxu1 %v5015_v63 }
 0x1ea   : > { %4835 = vmatprep.subr.bf16.mxu1 %v5016_v8 }
 0x1ed   : > { %4836 = vmatpush3.bf16.msra.mxu1 %v5016_v8 }
 0x1ee   : > { %4857 = vmatprep.subr.bf16.mxu1 %v5881_v13 }
 0x1f0   : > { %4818 = vmatmul.mubr.msk.bf16.gmra.mxu1 %vm553_vm0, %v2595_v29 }
 0x268   : > { %v4719_v9 = vpop.f32.mrf.mxu1 }
 0x26a   : > { %v1740_v27 = vpop.f32.mrf.mxu1 }
 0x26b   : > { %v4731_v7 = vpop.f32.mrf.mxu0 }
 0x26c   : > { %v4720_v19 = vpop.f32.mrf.mxu1  ;;  %v1838_v8 = vadd.f32 %v4731_v7, %v4719_v9 }
 0x26d   : > { %v1829_v31 = vpop.f32.mrf.mxu0 }
 0x26e   : > { %v1743_v22 = vpop.f32.mrf.mxu1  ;;  %v1830_v61 = vadd.f32 %v1829_v31, %v1740_v27 }
 0x26f   : > { %v4732_v36 = vpop.f32.mrf.mxu0 }
 0x270   : > { %v4723_v37 = vpop.f32.mrf.mxu1  ;;  %v1841_v10 = vadd.f32 %v4732_v36, %v4720_v19 }
 0x271   : > { %v1832_v51 = vpop.f32.mrf.mxu0 }
 0x272   : > { %v1756_v24 = vpop.f32.mrf.mxu1  ;;  %v1833_v34 = vadd.f32 %v1832_v51, %v1743_v22 }
 0x273   : > { %v4735_v3 = vpop.f32.mrf.mxu0 }
 0x274   : > { %v4724_v21 = vpop.f32.mrf.mxu1  ;;  %v1854_v1 = vadd.f32 %v4735_v3, %v4723_v37 }
 0x275   : > { %v1845_v4 = vpop.f32.mrf.mxu0 }
 0x276   : > { %v5884_v53 = vpop.f32.mrf.mxu1  ;;  %v1846_v42 = vadd.f32 %v1845_v4, %v1756_v24 }
 0x277   : > { %v4736_v62 = vpop.f32.mrf.mxu0 }
 0x278   : > { %v4743_v16 = vpop.f32.mrf.mxu1 }
 0x279   : > { %v1848_v12 = vpop.f32.mrf.mxu0  ;;  %v1976_v6 = vadd.f32 %v4743_v16, %v1838_v8 }
 0x27a   : > { %v1943_v30 = vpop.f32.mrf.mxu1 }
 0x27b   : > { %v4755_v56 = vpop.f32.mrf.mxu0  ;;  %v1974_v14 = vadd.f32 %v1943_v30, %v1830_v61 }
 0x27c   : > { %v4744_v40 = vpop.f32.mrf.mxu1  ;;  %v2098_v41 = vadd.f32 %v4755_v56, %v1976_v6 }
 0x27d   : > { %v2065_v49 = vpop.f32.mrf.mxu0  ;;  %v1977_v60 = vadd.f32 %v4744_v40, %v1841_v10  ;;  %v1849_v10 = vadd.f32 %v1848_v12, %v5884_v53 }
 0x27e   : > { %v1946_v59 = vpop.f32.mrf.mxu1  ;;  %v2096_v11 = vadd.f32 %v2065_v49, %v1974_v14 }
 0x27f   : > { %v4756_v17 = vpop.f32.mrf.mxu0  ;;  %v1975_v9 = vadd.f32 %v1946_v59, %v1833_v34 }
 0x280   : > { %v4747_v26 = vpop.f32.mrf.mxu1  ;;  %v2099_v16 = vadd.f32 %v4756_v17, %v1977_v60 }
 0x281   : > { %v2068_v18 = vpop.f32.mrf.mxu0 }
 0x282   : > { %v1959_v32 = vpop.f32.mrf.mxu1  ;;  %v2097_v36 = vadd.f32 %v2068_v18, %v1975_v9 }
 0x283   : > { %v4759_v33 = vpop.f32.mrf.mxu0  ;;  %v1978_v19 = vadd.f32 %v1959_v32, %v1846_v42 }
 0x284   : > { %v4748_v58 = vpop.f32.mrf.mxu1 }
 0x285   : > { %v2081_v25 = vpop.f32.mrf.mxu0 }
 0x286   : > { %v1962_v55 = vpop.f32.mrf.mxu1 }
 0x287   : > { %v4760_v47 = vpop.f32.mrf.mxu0  ;;  %v1979_v3 = vadd.f32 %v1962_v55, %v1849_v10 }
 0x288   : > { %v4767_v46 = vpop.f32.mrf.mxu1 }
 0x289   : > { %v5886_v52 = vpop.f32.mrf.mxu0  ;;  %v2212_v7 = vadd.f32 %v4767_v46, %v2098_v41 }
 0x28a   : > { %v2179_v57 = vpop.f32.mrf.mxu1 }
 0x28b   : > { %v4779_v2 = vpop.f32.mrf.mxu0  ;;  %v2210_v8 = vadd.f32 %v2179_v57, %v2096_v11 }
 0x28c   : > { %v4768_v44 = vpop.f32.mrf.mxu1  ;;  %v2334_v30 = vadd.f32 %v4779_v2, %v2212_v7 }
 0x28d   : > { %v2301_v45 = vpop.f32.mrf.mxu0  ;;  %v2213_v22 = vadd.f32 %v4768_v44, %v2099_v16 }
 0x28e   : > { %v2182_v48 = vpop.f32.mrf.mxu1  ;;  %v2332_v34 = vadd.f32 %v2301_v45, %v2210_v8 }
 0x28f   : > { %v4780_v39 = vpop.f32.mrf.mxu0  ;;  %v2211_v41 = vadd.f32 %v2182_v48, %v2097_v36 }
 0x290   : > { %v4771_v28 = vpop.f32.mrf.mxu1  ;;  %v2335_v11 = vadd.f32 %v4780_v39, %v2213_v22 }
 0x291   : > { %v2304_v43 = vpop.f32.mrf.mxu0 }
 0x292   : > { %v2195_v29 = vpop.f32.mrf.mxu1  ;;  %v2333_v49 = vadd.f32 %v2304_v43, %v2211_v41 }
 0x293   : > { %v4783_v50 = vpop.f32.mrf.mxu0 }
 0x294   : > { %v4772_v35 = vpop.f32.mrf.mxu1 }
 0x295   : > { %v2317_v63 = vpop.f32.mrf.mxu0 }
 0x296   : > { %v2198_v5 = vpop.f32.mrf.mxu1 }
 0x297   : > { %v5888_v38 = vpop.f32.mrf.mxu0 }
 0x298   : > { %6321 = vst [vmem:[#allocation23_spill] sm:$0xff] %v5888_v38  ;;  %v4791_v15 = vpop.f32.mrf.mxu1  ;;  %v1980_v38 = vadd.f32 %v4747_v26, %v1854_v1  ;;  %v2100_v1 = vadd.f32 %v2081_v25, %v1978_v19 }
 0x299   : > { %v5890_v0 = vpop.f32.mrf.mxu0  ;;  %v2456_v24 = vadd.f32 %v4791_v15, %v2334_v30  ;;  %v4318_v15 = vld [vmem:[%s6214_s6] ss:$0 sm:$0xff] }
 0x29a   : > { %6322 = vst [vmem:[#allocation25_spill] sm:$0xff] %v5890_v0  ;;  %v2423_v54 = vpop.f32.mrf.mxu1  ;;  %v1857_v0 = vadd.f32 %v4736_v62, %v4724_v21  ;;  %v2102_v6 = vadd.f32 %v4759_v33, %v1980_v38  ;;  %v2214_v62 = vadd.f32 %v2195_v29, %v2100_v1 }
 0x29b   : > { %v4803_v13 = vpop.f32.mrf.mxu0  ;;  %v2454_v21 = vadd.f32 %v2423_v54, %v2332_v34 }
 0x29c   : > { %v4792_v20 = vpop.f32.mrf.mxu1  ;;  %v1981_v37 = vadd.f32 %v4748_v58, %v1857_v0  ;;  %v2216_v4 = vadd.f32 %v4771_v28, %v2102_v6  ;;  %v2570_v59 = vadd.f32 %v4803_v13, %v2456_v24  ;;  %v2101_v0 = vadd.f32 %v5886_v52, %v1979_v3  ;;  %v2741_v24 = vld [vmem:[#allocation3 + $0x7] sm:$0xff] }
 0x29d   : > { %v2537_v23 = vpop.f32.mrf.mxu0  ;;  %v2457_v53 = vadd.f32 %v4792_v20, %v2335_v11  ;;  %v2336_v54 = vadd.f32 %v2317_v63, %v2214_v62  ;;  %v2765_v3 = vld [vmem:[#allocation3 + $0x8] sm:$0xff] }
 0x29e   : > { %v2426_v27 = vpop.f32.mrf.mxu1  ;;  %v2103_v42 = vadd.f32 %v4760_v47, %v1981_v37  ;;  %v2338_v38 = vadd.f32 %v4783_v50, %v2216_v4  ;;  %v2568_v26 = vadd.f32 %v2537_v23, %v2454_v21  ;;  %v2215_v33 = vadd.f32 %v2198_v5, %v2101_v0  ;;  %v6325_v62 = vld [vmem:[#allocation5_spill] sm:$0xff] }
 0x29f   : > { %v4804_v31 = vpop.f32.mrf.mxu0  ;;  %v2455_v18 = vadd.f32 %v2426_v27, %v2333_v49  ;;  %v6323_v46 = vld [vmem:[#allocation23_spill] sm:$0xff] }
 0x2a0   : > { %v4795_v61 = vpop.f32.mrf.mxu1  ;;  %v2217_v12 = vadd.f32 %v4772_v35, %v2103_v42  ;;  %v2571_v47 = vadd.f32 %v4804_v31, %v2457_v53  ;;  %v6326_v53 = vld [vmem:[#allocation7_spill] sm:$0xff] }
 0x2a1   : > { %v2540_v51 = vpop.f32.mrf.mxu0  ;;  %v2460_v58 = vadd.f32 %v4795_v61, %v2338_v38  ;;  %v6324_v28 = vld [vmem:[#allocation25_spill] sm:$0xff] }
 0x2a2   : > { %v2439_v14 = vpop.f32.mrf.mxu1  ;;  %v2339_v52 = vadd.f32 %v6323_v46, %v2217_v12  ;;  %v2569_v44 = vadd.f32 %v2540_v51, %v2455_v18  ;;  %v2337_v23 = vadd.f32 %v6324_v28, %v2215_v33  ;;  %v5020_v46 = vld [vmem:[%s6215_s7 + $0x30] sm:$0xff]   ;;  %v6331_v28 = vld [vmem:[#allocation12_spill] sm:$0xff] }
 0x2a3   : > { %v4807_v56 = vpop.f32.mrf.mxu0  ;;  %v2458_v57 = vadd.f32 %v2439_v14, %v2336_v54  ;;  %v6327_v54 = vld [vmem:[#allocation4_spill] sm:$0xff] }
 0x2a4   : > { %v4796_v60 = vpop.f32.mrf.mxu1  ;;  %v2574_v43 = vadd.f32 %v4807_v56, %v2460_v58  ;;  %v2749_v56 = vmul.f32 %v2741_v24, %v6325_v62  ;;  %v6328_v58 = vld [vmem:[#allocation6_spill] sm:$0xff] }
 0x2a5   : > { %v2553_v25 = vpop.f32.mrf.mxu0  ;;  %v2461_v5 = vadd.f32 %v4796_v60, %v2339_v52  ;;  %v6329_v52 = vld [vmem:[#allocation22_spill] sm:$0xff] }
 0x2a6   : > { %v2442_v40 = vpop.f32.mrf.mxu1  ;;  %v2572_v7 = vadd.f32 %v2553_v25, %v2458_v57 }
 0x2a7   : > { %v4808_v29 = vpop.f32.mrf.mxu0  ;;  %v2459_v31 = vadd.f32 %v2442_v40, %v2337_v23 }
 0x2a8   : > { %v4815_v17 = vpop.f32.mrf.mxu1  ;;  %v2575_v30 = vadd.f32 %v4808_v29, %v2461_v5  ;;  %v5021_v29 = vld [vmem:[%s6215_s7 + $0x48] sm:$0xff]  }
 0x2a9   : > { %v2692_v32 = vadd.f32 %v4815_v17, %v2570_v59  ;;  %v2556_v61 = vpop.f32.mrf.mxu0 }
 0x2aa   : > { %v2659_v55 = vpop.f32.mrf.mxu1  ;;  %v2573_v51 = vadd.f32 %v2556_v61, %v2459_v31  ;;  %v6334_v31 = vld [vmem:[#allocation9_spill] sm:$0xff] }
 0x2ab   : > { %v2707_v13 = vadd.f32 %v4318_v15, %v2692_v32  ;;  %v2690_v20 = vadd.f32 %v2659_v55, %v2568_v26  ;;  %v5018_v55 = vld [vmem:[%s6215_s7 + $0x20] sm:$0xff]  }
 0x2ac   : > { %v4816_v2 = vpop.f32.mrf.mxu1 }
 0x2ad   : > { %v2715_v45 = vmax.f32 %v2707_v13, 0.0  ;;  %v2705_v48 = vadd.f32 %v4318_v15, %v2690_v20  ;;  %v2693_v39 = vadd.f32 %v4816_v2, %v2571_v47 }
 0x2ae   : > { %v2662_v50 = vpop.f32.mrf.mxu1 }
 0x2af   : > { %2735 = vst.msk [vmem:[#allocation3 + $0x20] sm:$0xff] %vm553_vm0, %v2715_v45  ;;  %v2713_v35 = vmax.f32 %v2705_v48, 0.0  ;;  %v2708_v63 = vadd.f32 %v4318_v15, %v2693_v39  ;;  %v2691_v9 = vadd.f32 %v2662_v50, %v2569_v44  ;;  %v6330_v48 = vld [vmem:[#allocation13_spill] sm:$0xff]  ;;  %v6332_v50 = vld [vmem:[#allocation8_spill] sm:$0xff] }
 0x2b0   : > { %v4819_v27 = vpop.f32.mrf.mxu1 }
 0x2b1   : > { %2733 = vst.msk [vmem:[#allocation3 + $0x10] sm:$0xff] %vm553_vm0, %v2713_v35  ;;  %v2716_v16 = vmax.f32 %v2708_v63, 0.0  ;;  %v2706_v8 = vadd.f32 %v4318_v15, %v2691_v9  ;;  %v2696_v19 = vadd.f32 %v4819_v27, %v2574_v43  ;;  %v6333_v35 = vld [vmem:[#allocation24_spill] sm:$0xff] }
 0x2b2   : > { %v2675_v36 = vpop.f32.mrf.mxu1 }
 0x2b3   : > { %2736 = vst.msk [vmem:[#allocation3 + $0x28] sm:$0xff] %vm553_vm0, %v2716_v16  ;;  %v2714_v22 = vmax.f32 %v2706_v8, 0.0  ;;  %v2711_v10 = vadd.f32 %v4318_v15, %v2696_v19  ;;  %v2694_v6 = vadd.f32 %v2675_v36, %v2572_v7  ;;  %v5023_v7 = vld [vmem:[%s6215_s7 + $0x58] sm:$0xff]  }
 0x2b4   : > { %v4820_v37 = vpop.f32.mrf.mxu1 }
 0x2b5   : > { %2734 = vst.msk [vmem:[#allocation3 + $0x18] sm:$0xff] %vm553_vm0, %v2714_v22  ;;  %v2719_v14 = vmax.f32 %v2711_v10, 0.0  ;;  %v2709_v34 = vadd.f32 %v4318_v15, %v2694_v6  ;;  %v2697_v41 = vadd.f32 %v4820_v37, %v2575_v30  ;;  %v6335_v30 = vld [vmem:[#allocation15_spill] sm:$0xff]  ;;  %v6336_v10 = vld [vmem:[#allocation14_spill] sm:$0xff] }
 0x2b6   : > { %v2678_v1 = vpop.f32.mrf.mxu1  ;;  %v5912_v17 = vld [vmem:[#allocation3 + $0x20] sm:$0xff] }
 0x2b7   : > { %2739 = vst.msk [vmem:[#allocation3 + $0x40] sm:$0xff] %vm553_vm0, %v2719_v14  ;;  %v2717_v4 = vmax.f32 %v2709_v34, 0.0  ;;  %v2712_v60 = vadd.f32 %v4318_v15, %v2697_v41  ;;  %v2695_v11 = vadd.f32 %v2678_v1, %v2573_v51 }
 0x2b8   : > { %v5904_v21 = vld [vmem:[#allocation3 + $0x10] sm:$0xff] }
 0x2b9   : > { %v2742_v42 = vld [vmem:[#allocation3 + $0xf] sm:$0xff]  ;;  %2737 = vst.msk [vmem:[#allocation3 + $0x30] sm:$0xff] %vm553_vm0, %v2717_v4  ;;  %v2720_v40 = vmax.f32 %v2712_v60, 0.0  ;;  %v2710_v49 = vadd.f32 %v4318_v15, %v2695_v11  ;;  %v2773_v59 = vpack.c.bf16 %v5904_v21, %v2765_v3  ;;  %v6337_v3 = vld [vmem:[#allocation11_spill] sm:$0xff]  ;;  %v6338_v11 = vld [vmem:[#allocation16_spill] sm:$0xff] }
 0x2ba   : > { %v2750_v0 = vmul.f32 %v2742_v42, %v6326_v53  ;;  %v5933_v47 = vld [vmem:[#allocation3 + $0x27] sm:$0xff]  ;;  %v3090_v51 = vmul.f32 %v2742_v42, %v6325_v62 }
 0x2bb   : > { %2740 = vst.msk [vmem:[#allocation3 + $0x48] sm:$0xff] %vm553_vm0, %v2720_v40  ;;  %v2718_v38 = vmax.f32 %v2710_v49, 0.0  ;;  %4825 = vmatprep.mubr.msk.bf16.mxu0 %vm553_vm0, %v2773_v59  ;;  %v5943_v57 = vld [vmem:[#allocation3 + $0x28] sm:$0xff]  ;;  %v2753_v39 = vmul.f32 %v5933_v47, %v6330_v48 }
 0x2bc   : > { %v2757_v12 = vpack.c.bf16 %v2750_v0, %v2749_v56  ;;  %v5914_v26 = vld [vmem:[#allocation3 + $0x18] sm:$0xff]  ;;  %v2960_v43 = vld [vmem:[#allocation3 + $0x9] sm:$0xff]  ;;  %v5997_v1 = vld [vmem:[#allocation3 + $0x21] sm:$0xff] }
 0x2bd   : > { %v5916_v18 = vld [vmem:[#allocation3 + $0x17] sm:$0xff]  ;;  %v5918_v32 = vld [vmem:[#allocation3 + $0x1f] sm:$0xff]  ;;  %2738 = vst.msk [vmem:[#allocation3 + $0x38] sm:$0xff] %vm553_vm0, %v2718_v38  ;;  %v5924_v15 = vpack.c.bf16 %v5912_v17, %v5914_v26  ;;  %v2968_v16 = vmul.f32 %v2960_v43, %v6334_v31  ;;  %v6340_v59 = vld [vmem:[#allocation17_spill] sm:$0xff] }
 0x2be   : > { %4837 = vmatprep.mubr.msk.bf16.mxu1 %vm553_vm0, %v2757_v12  ;;  %v2751_v33 = vmul.f32 %v5916_v18, %v6327_v54  ;;  %v2752_v25 = vmul.f32 %v5918_v32, %v6328_v58  ;;  %v5937_v20 = vld [vmem:[#allocation3 + $0x11] sm:$0xff]  ;;  %v5966_v9 = vld [vmem:[#allocation3 + $0x40] sm:$0xff]  ;;  %v3091_v61 = vmul.f32 %v5916_v18, %v6326_v53  ;;  %v3092_v49 = vmul.f32 %v5918_v32, %v6327_v54 }
 0x2bf   : > { %4826 = vmatmul.mubr.msk.bf16.vlgmr.msra.gmra.mxu0 %vm553_vm0, %v5924_v15  ;;  %v2969_v5 = vmul.f32 %v5937_v20, %v6332_v50  ;;  %v5990_v14 = vld [vmem:[#allocation3 + $0x19] sm:$0xff]  ;;  %v6339_v56 = vld [vmem:[#allocation10_spill] sm:$0xff] }
 0x2c0   : > { %v2758_v13 = vpack.c.bf16 %v2752_v25, %v2751_v33  ;;  %4846 = vmatpush3.bf16.msra.mxu0 %v6329_v52  ;;  %v5945_v2 = vld [vmem:[#allocation3 + $0x30] sm:$0xff]  ;;  %v3098_v24 = vpack.c.bf16 %v3091_v61, %v3090_v51  ;;  %v2970_v4 = vmul.f32 %v5990_v14, %v6337_v3  ;;  %v2971_v40 = vmul.f32 %v5997_v1, %v6339_v56  ;;  %v5022_v25 = vld [vmem:[%s6215_s7 + $0x40] sm:$0xff]  }
 0x2c1   : > { %v5947_v44 = vld [vmem:[#allocation3 + $0x2f] sm:$0xff]  ;;  %v5952_v45 = vpack.c.bf16 %v5945_v2, %v5943_v57  ;;  %4847 = vmatprep.subr.bf16.mxu0 %v5018_v55  ;;  %v2976_v37 = vpack.c.bf16 %v2969_v5, %v2968_v16  ;;  %v3093_v33 = vmul.f32 %v5933_v47, %v6328_v58  ;;  %v6341_v5 = vld [vmem:[#allocation19_spill] sm:$0xff]  ;;  %v3327_v51 = vmul.f32 %v5990_v14, %v6332_v50 }
 0x2c2   : > { %4838 = vmatmul.mubr.msk.bf16.vlgmr.msra.gmra.mxu1 %vm553_vm0, %v2758_v13  ;;  %v2754_v23 = vmul.f32 %v5947_v44, %v6331_v28  ;;  %v6002_v60 = vld [vmem:[#allocation3 + $0x29] sm:$0xff]  ;;  %v2977_v12 = vpack.c.bf16 %v2971_v40, %v2970_v4  ;;  %v3094_v13 = vmul.f32 %v5947_v44, %v6330_v48  ;;  %v6029_v43 = vld [vmem:[#allocation3 + $0x41] sm:$0xff] }
 0x2c3   : > { %4858 = vmatpush3.bf16.msra.mxu1 %v6333_v35  ;;  %4829 = vmatprep.mubr.msk.bf16.mxu0 %vm553_vm0, %v5952_v45  ;;  %v2972_v0 = vmul.f32 %v6002_v60, %v6340_v59  ;;  %v3099_v52 = vpack.c.bf16 %v3093_v33, %v3092_v49  ;;  %v6038_v16 = vld [vmem:[#allocation3 + $0x47] sm:$0xff]  ;;  %v3328_v49 = vmul.f32 %v5997_v1, %v6337_v3  ;;  %v5028_v33 = vld [vmem:[%s6215_s7 + $0x70] sm:$0xff]  }
 0x2c4   : > { %v2759_v63 = vpack.c.bf16 %v2754_v23, %v2753_v39  ;;  %4859 = vmatprep.subr.bf16.mxu1 %v5020_v46  ;;  %v5971_v27 = vld [vmem:[#allocation3 + $0x38] sm:$0xff]  ;;  %4848 = vmatpush3.bf16.msra.mxu0 %v5018_v55  ;;  %v5024_v39 = vld [vmem:[%s6215_s7 + $0x50] sm:$0xff]  }
 0x2c5   : > { %v5974_v8 = vld [vmem:[#allocation3 + $0x37] sm:$0xff]  ;;  %v5976_v19 = vld [vmem:[#allocation3 + $0x3f] sm:$0xff]  ;;  %v5983_v36 = vpack.c.bf16 %v5966_v9, %v5971_v27  ;;  %4869 = vmatprep.subr.bf16.mxu0 %v5021_v29 }
 0x2c6   : > { %4841 = vmatprep.mubr.msk.bf16.mxu1 %vm553_vm0, %v2759_v63  ;;  %v2755_v22 = vmul.f32 %v5974_v8, %v6335_v30  ;;  %v2756_v6 = vmul.f32 %v5976_v19, %v6336_v10  ;;  %v5994_v41 = vld [vmem:[#allocation3 + $0x31] sm:$0xff]  ;;  %v3095_v38 = vmul.f32 %v5974_v8, %v6331_v28  ;;  %v5025_v63 = vld [vmem:[%s6215_s7 + $0x68] sm:$0xff]  }
 0x2c7   : > { %4860 = vmatpush3.bf16.msra.mxu1 %v5020_v46  ;;  %4830 = vmatmul.mubr.msk.bf16.gmra.mxu0 %vm553_vm0, %v5983_v36  ;;  %v2973_v42 = vmul.f32 %v5994_v41, %v6338_v11  ;;  %v6022_v46 = vld [vmem:[#allocation3 + $0x39] sm:$0xff]  ;;  %v3330_v40 = vmul.f32 %v5994_v41, %v6340_v59 }
 0x2c8   : > { %v2760_v34 = vpack.c.bf16 %v2756_v6, %v2755_v22  ;;  %4881 = vmatprep.subr.bf16.mxu1 %v5023_v7  ;;  %4849 = vmatprep.mubr.msk.bf16.mxu0 %vm553_vm0, %v2976_v37  ;;  %v3100_v23 = vpack.c.bf16 %v3095_v38, %v3094_v13  ;;  %v2974_v35 = vmul.f32 %v6022_v46, %v6341_v5  ;;  %v5027_v6 = vld [vmem:[%s6215_s7 + $0x78] sm:$0xff]  }
 0x2c9   : > { %v2978_v55 = vpack.c.bf16 %v2973_v42, %v2972_v0  ;;  %v3096_v22 = vmul.f32 %v5976_v19, %v6335_v30  ;;  %v3326_v37 = vmul.f32 %v5937_v20, %v6334_v31  ;;  %v3329_v20 = vmul.f32 %v6002_v60, %v6339_v56  ;;  %v5026_v0 = vld [vmem:[%s6215_s7 + $0x60] sm:$0xff]  }
 0x2ca   : > { %4842 = vmatmul.mubr.msk.bf16.gmra.mxu1 %vm553_vm0, %v2760_v34  ;;  %v3214_v38 = vpack.c.bf16 %v5971_v27, %v5945_v2  ;;  %v3211_v2 = vld [vmem:[#allocation3 + $0x48] sm:$0xff]  ;;  %v3448_v27 = vmul.f32 %v5916_v18, %v6325_v62  ;;  %v3332_v13 = vmul.f32 %v6029_v43, %v6341_v5  ;;  %v3451_v62 = vmul.f32 %v5947_v44, %v6328_v58  ;;  %v3569_v44 = vld [vmem:[#allocation3 + $0x50] sm:$0xff] }
 0x2cb   : > { %4861 = vmatprep.mubr.msk.bf16.mxu1 %vm553_vm0, %v3098_v24  ;;  %v3212_v24 = vpack.c.bf16 %v5914_v26, %v5904_v21  ;;  %v3334_v42 = vpack.c.bf16 %v3327_v51, %v3326_v37  ;;  %v3331_v21 = vmul.f32 %v6022_v46, %v6338_v11  ;;  %v3213_v26 = vpack.c.bf16 %v5943_v57, %v5912_v17  ;;  %v3325_v57 = vld [vmem:[#allocation3 + $0x49] sm:$0xff] }
 0x2cc   : > { %v3453_v18 = vmul.f32 %v5976_v19, %v6331_v28  ;;  %v3684_v58 = vmul.f32 %v5990_v14, %v6334_v31  ;;  %v3688_v31 = vmul.f32 %v6022_v46, %v6340_v59  ;;  %v3686_v19 = vmul.f32 %v6002_v60, %v6337_v3  ;;  %v5031_v3 = vld [vmem:[%s6217_s9 + $0x8] sm:$0xff]   ;;  %v5032_v60 = vld [vmem:[%s6217_s9] sm:$0xff]  }
 0x2cd   : > { %v3336_v17 = vpack.c.bf16 %v3331_v21, %v3330_v40  ;;  %v3690_v14 = vmul.f32 %v3325_v57, %v6341_v5  ;;  %v5035_v59 = vld [vmem:[%s6219_s11 + $0x28] sm:$0xff]   ;;  %v5036_v46 = vld [vmem:[%s6219_s11 + $0x20] sm:$0xff]  }
 0x2cf   : > { %4850 = vmatmul.mubr.msk.bf16.vlgmr.msra.gmra.mxu0 %vm553_vm0, %v2977_v12  ;;  %v3335_v12 = vpack.c.bf16 %v3329_v20, %v3328_v49 }
 0x2d0   : > { %4870 = vmatpush3.bf16.msra.mxu0 %v5021_v29  ;;  %4853 = vmatprep.mubr.msk.bf16.mxu0 %vm553_vm0, %v2978_v55  ;;  %v6342_v29 = vld [vmem:[#allocation18_spill] sm:$0xff]  ;;  %v3449_v55 = vmul.f32 %v5918_v32, %v6326_v53  ;;  %v3452_v53 = vmul.f32 %v5974_v8, %v6330_v48  ;;  %v3450_v32 = vmul.f32 %v5933_v47, %v6327_v54 }
 0x2d1   : > { %4871 = vmatprep.subr.bf16.mxu0 %v5022_v25  ;;  %v2975_v61 = vmul.f32 %v6029_v43, %v6342_v29  ;;  %v3685_v47 = vmul.f32 %v5997_v1, %v6332_v50  ;;  %v3687_v8 = vmul.f32 %v5994_v41, %v6339_v56  ;;  %v3689_v50 = vmul.f32 %v6029_v43, %v6338_v11  ;;  %v5033_v11 = vld [vmem:[%s6219_s11 + $0x38] sm:$0xff]   ;;  %v5034_v56 = vld [vmem:[%s6219_s11 + $0x30] sm:$0xff]  }
 0x2d2   : > { %4862 = vmatmul.mubr.msk.bf16.vlgmr.msra.gmra.mxu1 %vm553_vm0, %v3099_v52  ;;  %v3333_v52 = vmul.f32 %v3325_v57, %v6342_v29  ;;  %v5037_v43 = vld [vmem:[%s6219_s11 + $0x18] sm:$0xff]  }
 0x2d3   : > { %4865 = vmatprep.mubr.msk.bf16.mxu1 %vm553_vm0, %v3100_v23  ;;  %4882 = vmatpush3.bf16.msra.mxu1 %v5023_v7  ;;  %v2979_v34 = vpack.c.bf16 %v2975_v61, %v2974_v35  ;;  %v3097_v7 = vmul.f32 %v6038_v16, %v6336_v10  ;;  %v3456_v23 = vpack.c.bf16 %v3449_v55, %v3448_v27 }
 0x2d4   : > { %4883 = vmatprep.subr.bf16.mxu1 %v5024_v39  ;;  %4872 = vmatpush3.bf16.msra.mxu0 %v5022_v25  ;;  %v5029_v25 = vld [vmem:[%s6215_s7 + $0x88] sm:$0xff]   ;;  %v3337_v35 = vpack.c.bf16 %v3333_v52, %v3332_v13  ;;  %v3458_v61 = vpack.c.bf16 %v3453_v18, %v3452_v53  ;;  %v3692_v28 = vpack.c.bf16 %v3685_v47, %v3684_v58 }
 0x2d5   : > { %4893 = vmatprep.subr.bf16.mxu0 %v5025_v63  ;;  %v3101_v4 = vpack.c.bf16 %v3097_v7, %v3096_v22  ;;  %v3447_v22 = vld [vmem:[#allocation3 + $0x4f] sm:$0xff] }
 0x2d6   : > { %v3455_v54 = vmul.f32 %v3447_v22, %v6336_v10  ;;  %v3683_v10 = vld [vmem:[#allocation3 + $0x51] sm:$0xff] }
 0x2d7   : > { %4884 = vmatpush3.bf16.msra.mxu1 %v5024_v39  ;;  %4854 = vmatmul.mubr.msk.bf16.gmra.mxu0 %vm553_vm0, %v2979_v34  ;;  %v3215_v39 = vpack.c.bf16 %v3211_v2, %v5966_v9  ;;  %v3457_v9 = vpack.c.bf16 %v3451_v62, %v3450_v32  ;;  %v3691_v41 = vmul.f32 %v3683_v10, %v6342_v29 }
 0x2d8   : > { %4905 = vmatprep.subr.bf16.mxu1 %v5027_v6  ;;  %4873 = vmatprep.mubr.msk.bf16.mxu0 %vm553_vm0, %v3212_v24 }
 0x2d9   : > { %v3695_v1 = vpack.c.bf16 %v3691_v41, %v3690_v14 }
 0x2da   : > { %4866 = vmatmul.mubr.msk.bf16.gmra.mxu1 %vm553_vm0, %v3101_v4 }
 0x2db   : > { %4885 = vmatprep.mubr.msk.bf16.mxu1 %vm553_vm0, %v3334_v42 }
 0x2df   : > { %4874 = vmatmul.mubr.msk.bf16.vlgmr.msra.gmra.mxu0 %vm553_vm0, %v3213_v26 }
 0x2e0   : > { %4894 = vmatpush3.bf16.msra.mxu0 %v5025_v63  ;;  %4877 = vmatprep.mubr.msk.bf16.mxu0 %vm553_vm0, %v3214_v38  ;;  %v5030_v63 = vld [vmem:[%s6215_s7 + $0x80] sm:$0xff]  }
 0x2e1   : > { %4895 = vmatprep.subr.bf16.mxu0 %v5026_v0 }
 0x2e2   : > { %4886 = vmatmul.mubr.msk.bf16.vlgmr.msra.gmra.mxu1 %vm553_vm0, %v3335_v12 }
 0x2e3   : > { %4889 = vmatprep.mubr.msk.bf16.mxu1 %vm553_vm0, %v3336_v17  ;;  %4906 = vmatpush3.bf16.msra.mxu1 %v5027_v6 }
 0x2e4   : > { %4907 = vmatprep.subr.bf16.mxu1 %v5028_v33  ;;  %4896 = vmatpush3.bf16.msra.mxu0 %v5026_v0 }
 0x2e5   : > { %4917 = vmatprep.subr.bf16.mxu0 %v5029_v25 }
 0x2e7   : > { %4908 = vmatpush3.bf16.msra.mxu1 %v5028_v33  ;;  %4878 = vmatmul.mubr.msk.bf16.gmra.mxu0 %vm553_vm0, %v3215_v39 }
 0x2e8   : > { %4897 = vmatprep.mubr.msk.bf16.mxu0 %vm553_vm0, %v3456_v23  ;;  %4929 = vmatprep.subr.bf16.mxu1 %v5031_v3 }
 0x2ea   : > { %4890 = vmatmul.mubr.msk.bf16.gmra.mxu1 %vm553_vm0, %v3337_v35 }
 0x2eb   : > { %4909 = vmatprep.mubr.msk.bf16.mxu1 %vm553_vm0, %v5924_v15  ;;  %v3454_v15 = vmul.f32 %v6038_v16, %v6335_v30  ;;  %v3694_v30 = vpack.c.bf16 %v3689_v50, %v3688_v31 }
 0x2ed   : > { %v3459_v48 = vpack.c.bf16 %v3455_v54, %v3454_v15 }
 0x2ef   : > { %4898 = vmatmul.mubr.msk.bf16.vlgmr.msra.gmra.mxu0 %vm553_vm0, %v3457_v9 }
 0x2f0   : > { %4918 = vmatpush3.bf16.msra.mxu0 %v5029_v25  ;;  %4901 = vmatprep.mubr.msk.bf16.mxu0 %vm553_vm0, %v3458_v61 }
 0x2f1   : > { %4919 = vmatprep.subr.bf16.mxu0 %v5030_v63 }
 0x2f2   : > { %4910 = vmatmul.mubr.msk.bf16.vlgmr.msra.gmra.mxu1 %vm553_vm0, %v5952_v45  ;;  %v3573_v45 = vpack.c.bf16 %v3569_v44, %v3211_v2 }
 0x2f3   : > { %4913 = vmatprep.mubr.msk.bf16.mxu1 %vm553_vm0, %v5983_v36  ;;  %v3693_v36 = vpack.c.bf16 %v3687_v8, %v3686_v19  ;;  %4930 = vmatpush3.bf16.msra.mxu1 %v5031_v3 }
 0x2f4   : > { %4920 = vmatpush3.bf16.msra.mxu0 %v5030_v63  ;;  %4931 = vmatprep.subr.bf16.mxu1 %v5032_v60 }
 0x2f5   : > { %4941 = vmatprep.subr.bf16.mxu0 %v5033_v11 }
 0x2f7   : > { %4902 = vmatmul.mubr.msk.bf16.gmra.mxu0 %vm553_vm0, %v3459_v48  ;;  %4932 = vmatpush3.bf16.msra.mxu1 %v5032_v60 }
 0x2f8   : > { %4921 = vmatprep.mubr.msk.bf16.mxu0 %vm553_vm0, %v3692_v28 }
 0x2fa   : > { %4914 = vmatmul.mubr.msk.bf16.gmra.mxu1 %vm553_vm0, %v3573_v45 }
 0x2ff   : > { %4922 = vmatmul.mubr.msk.bf16.vlgmr.msra.gmra.mxu0 %vm553_vm0, %v3693_v36 }
 0x300   : > { %4925 = vmatprep.mubr.msk.bf16.mxu0 %vm553_vm0, %v3694_v30  ;;  %4942 = vmatpush3.bf16.msra.mxu0 %v5033_v11 }
 0x301   : > { %4943 = vmatprep.subr.bf16.mxu0 %v5034_v56 }
 0x304   : > { %4944 = vmatpush3.bf16.msra.mxu0 %v5034_v56 }
 0x305   : > { %4945 = vmatprep.subr.bf16.mxu0 %v5035_v59 }
 0x307   : > { %4926 = vmatmul.mubr.msk.bf16.gmra.mxu0 %vm553_vm0, %v3695_v1 }
 0x308   : > { %4946 = vmatpush3.bf16.msra.mxu0 %v5035_v59 }
 0x309   : > { %4947 = vmatprep.subr.bf16.mxu0 %v5036_v46 }
 0x30c   : > { %4948 = vmatpush3.bf16.msra.mxu0 %v5036_v46 }
 0x30d   : > { %4949 = vmatprep.subr.bf16.mxu0 %v5037_v43 }
 0x310   : > { %4950 = vmatpush3.bf16.msra.mxu0 %v5037_v43 }
 0x37f   : > { %v4827_v5 = vpop.f32.mrf.mxu0 }
 0x381   : > { %v2840_v16 = vpop.f32.mrf.mxu0 }
 0x382   : > { %v4839_v29 = vpop.f32.mrf.mxu1 }
 0x383   : > { %v4828_v6 = vpop.f32.mrf.mxu0  ;;  %v2938_v31 = vadd.f32 %v4839_v29, %v4827_v5 }
 0x384   : > { %v2929_v37 = vpop.f32.mrf.mxu1 }
 0x385   : > { %v2843_v51 = vpop.f32.mrf.mxu0  ;;  %v2930_v8 = vadd.f32 %v2929_v37, %v2840_v16 }
 0x386   : > { %v4840_v34 = vpop.f32.mrf.mxu1 }
 0x387   : > { %v4831_v7 = vpop.f32.mrf.mxu0  ;;  %v2941_v36 = vadd.f32 %v4840_v34, %v4828_v6 }
 0x388   : > { %v2932_v24 = vpop.f32.mrf.mxu1 }
 0x389   : > { %v2856_v4 = vpop.f32.mrf.mxu0  ;;  %v2933_v1 = vadd.f32 %v2932_v24, %v2843_v51 }
 0x38a   : > { %v4843_v42 = vpop.f32.mrf.mxu1 }
 0x38b   : > { %v4832_v20 = vpop.f32.mrf.mxu0  ;;  %v2954_v29 = vadd.f32 %v4843_v42, %v4831_v7 }
 0x38c   : > { %v2945_v40 = vpop.f32.mrf.mxu1 }
 0x38d   : > { %v2859_v21 = vpop.f32.mrf.mxu0 }
 0x38e   : > { %v4844_v26 = vpop.f32.mrf.mxu1 }
 0x38f   : > { %v4851_v0 = vpop.f32.mrf.mxu0  ;;  %v2957_v6 = vadd.f32 %v4844_v26, %v4832_v20 }
 0x390   : > { %v2948_v49 = vpop.f32.mrf.mxu1  ;;  %v3076_v10 = vadd.f32 %v4851_v0, %v2938_v31 }
 0x391   : > { %v3043_v38 = vpop.f32.mrf.mxu0 }
 0x392   : > { %v4863_v12 = vpop.f32.mrf.mxu1  ;;  %v3074_v30 = vadd.f32 %v3043_v38, %v2930_v8  ;;  %v2949_v8 = vadd.f32 %v2948_v49, %v2859_v21 }
 0x393   : > { %v4852_v33 = vpop.f32.mrf.mxu0  ;;  %v3198_v46 = vadd.f32 %v4863_v12, %v3076_v10 }
 0x394   : > { %v3165_v17 = vpop.f32.mrf.mxu1  ;;  %v3077_v3 = vadd.f32 %v4852_v33, %v2941_v36 }
 0x395   : > { %v3046_v57 = vpop.f32.mrf.mxu0  ;;  %v3196_v56 = vadd.f32 %v3165_v17, %v3074_v30 }
 0x396   : > { %v4864_v25 = vpop.f32.mrf.mxu1  ;;  %v3075_v59 = vadd.f32 %v3046_v57, %v2933_v1 }
 0x397   : > { %v4855_v2 = vpop.f32.mrf.mxu0  ;;  %v3199_v16 = vadd.f32 %v4864_v25, %v3077_v3 }
 0x398   : > { %v3168_v27 = vpop.f32.mrf.mxu1  ;;  %v3080_v51 = vadd.f32 %v4855_v2, %v2954_v29 }
 0x399   : > { %v3059_v55 = vpop.f32.mrf.mxu0  ;;  %v3197_v34 = vadd.f32 %v3168_v27, %v3075_v59 }
 0x39a   : > { %v4867_v13 = vpop.f32.mrf.mxu1 }
 0x39b   : > { %v4856_v52 = vpop.f32.mrf.mxu0  ;;  %v3202_v7 = vadd.f32 %v4867_v13, %v3080_v51 }
 0x39c   : > { %v3181_v39 = vpop.f32.mrf.mxu1  ;;  %v3081_v31 = vadd.f32 %v4856_v52, %v2957_v6 }
 0x39d   : > { %v3062_v23 = vpop.f32.mrf.mxu0 }
 0x39e   : > { %v4868_v35 = vpop.f32.mrf.mxu1  ;;  %v3079_v12 = vadd.f32 %v3062_v23, %v2949_v8 }
 0x39f   : > { %v4875_v53 = vpop.f32.mrf.mxu0  ;;  %v3203_v26 = vadd.f32 %v4868_v35, %v3081_v31 }
 0x3a0   : > { %v6158_v62 = vpop.f32.mrf.mxu1  ;;  %v3312_v37 = vadd.f32 %v4875_v53, %v3198_v46 }
 0x3a1   : > { %v3279_v18 = vpop.f32.mrf.mxu0  ;;  %v3201_v49 = vadd.f32 %v6158_v62, %v3079_v12 }
 0x3a2   : > { %v4887_v32 = vpop.f32.mrf.mxu1  ;;  %v3310_v5 = vadd.f32 %v3279_v18, %v3196_v56 }
 0x3a3   : > { %v4876_v9 = vpop.f32.mrf.mxu0  ;;  %v3434_v36 = vadd.f32 %v4887_v32, %v3312_v37 }
 0x3a4   : > { %v3401_v63 = vpop.f32.mrf.mxu1  ;;  %v3313_v38 = vadd.f32 %v4876_v9, %v3199_v16 }
 0x3a5   : > { %v3282_v61 = vpop.f32.mrf.mxu0  ;;  %v3432_v17 = vadd.f32 %v3401_v63, %v3310_v5 }
 0x3a6   : > { %v4888_v22 = vpop.f32.mrf.mxu1  ;;  %v3311_v57 = vadd.f32 %v3282_v61, %v3197_v34 }
 0x3a7   : > { %v4879_v15 = vpop.f32.mrf.mxu0 }
 0x3a8   : > { %v3404_v54 = vpop.f32.mrf.mxu1  ;;  %v3316_v2 = vadd.f32 %v4879_v15, %v3202_v7  ;;  %v4405_v15 = vld [vmem:[%s6216_s8] ss:$0 sm:$0xff] }
 0x3a9   : > { %v3295_v58 = vpop.f32.mrf.mxu0  ;;  %v3433_v27 = vadd.f32 %v3404_v54, %v3311_v57 }
 0x3aa   : > { %v6160_v47 = vpop.f32.mrf.mxu1 }
 0x3ab   : > { %6343 = vst [vmem:[#allocation20_spill] sm:$0xff] %v6160_v47  ;;  %v4880_v44 = vpop.f32.mrf.mxu0 }
 0x3ac   : > { %v3417_v48 = vpop.f32.mrf.mxu1  ;;  %v3317_v18 = vadd.f32 %v4880_v44, %v3203_v26 }
 0x3ad   : > { %v3298_v28 = vpop.f32.mrf.mxu0 }
 0x3ae   : > { %v6162_v45 = vpop.f32.mrf.mxu1  ;;  %v3315_v32 = vadd.f32 %v3298_v28, %v3201_v49  ;;  %v5038_v49 = vld [vmem:[%s6219_s11 + $0x10] sm:$0xff]  }
 0x3af   : > { %6344 = vst [vmem:[#allocation21_spill] sm:$0xff] %v6162_v45  ;;  %v4899_v50 = vpop.f32.mrf.mxu0  ;;  %v2946_v45 = vadd.f32 %v2945_v40, %v2856_v4  ;;  %v3435_v40 = vadd.f32 %v4888_v22, %v3313_v38  ;;  %4951 = vmatprep.subr.bf16.mxu0 %v5038_v49 }
 0x3b0   : > { %v6164_v19 = vpop.f32.mrf.mxu1  ;;  %v3556_v42 = vadd.f32 %v4899_v50, %v3434_v36  ;;  %4952 = vmatpush3.bf16.msra.mxu0 %v5038_v49 }
 0x3b1   : > { %6345 = vst [vmem:[#allocation23_spill] sm:$0xff] %v6164_v19  ;;  %v3523_v14 = vpop.f32.mrf.mxu0  ;;  %v3078_v0 = vadd.f32 %v3059_v55, %v2946_v45 }
 0x3b2   : > { %v4911_v41 = vpop.f32.mrf.mxu1  ;;  %v3554_v25 = vadd.f32 %v3523_v14, %v3432_v17  ;;  %v6346_v50 = vld [vmem:[#allocation20_spill] sm:$0xff] }
 0x3b3   : > { %v4900_v60 = vpop.f32.mrf.mxu0  ;;  %v3200_v4 = vadd.f32 %v3181_v39, %v3078_v0  ;;  %v3670_v63 = vadd.f32 %v4911_v41, %v3556_v42  ;;  %v3438_v10 = vadd.f32 %v6346_v50, %v3316_v2  ;;  %v5039_v2 = vld [vmem:[%s6219_s11 + $0x8] sm:$0xff]  }
 0x3b4   : > { %v3637_v11 = vpop.f32.mrf.mxu1  ;;  %v3557_v21 = vadd.f32 %v4900_v60, %v3435_v40  ;;  %4953 = vmatprep.subr.bf16.mxu0 %v5039_v2 }
 0x3b5   : > { %v3526_v43 = vpop.f32.mrf.mxu0  ;;  %v3314_v55 = vadd.f32 %v3295_v58, %v3200_v4  ;;  %v3668_v9 = vadd.f32 %v3637_v11, %v3554_v25  ;;  %4954 = vmatpush3.bf16.msra.mxu0 %v5039_v2 }
 0x3b6   : > { %v4912_v47 = vpop.f32.mrf.mxu1  ;;  %v3555_v23 = vadd.f32 %v3526_v43, %v3433_v27  ;;  %v6347_v58 = vld [vmem:[#allocation21_spill] sm:$0xff] }
 0x3b7   : > { %v4903_v19 = vpop.f32.mrf.mxu0  ;;  %v3436_v22 = vadd.f32 %v3417_v48, %v3314_v55  ;;  %v3671_v13 = vadd.f32 %v4912_v47, %v3557_v21  ;;  %v3439_v14 = vadd.f32 %v6347_v58, %v3317_v18 }
 0x3b8   : > { %v3640_v24 = vpop.f32.mrf.mxu1  ;;  %v6348_v28 = vld [vmem:[#allocation23_spill] sm:$0xff]  ;;  %v3560_v3 = vadd.f32 %v4903_v19, %v3438_v10 }
 0x3b9   : > { %v3539_v33 = vpop.f32.mrf.mxu0  ;;  %v3669_v1 = vadd.f32 %v3640_v24, %v3555_v23  ;;  %v3437_v41 = vadd.f32 %v6348_v28, %v3315_v32  ;;  %v4406_v23 = vld [vmem:[%s6218_s10] ss:$0 sm:$0xff] }
 0x3ba   : > { %v4915_v53 = vpop.f32.mrf.mxu1  ;;  %v3558_v62 = vadd.f32 %v3539_v33, %v3436_v22 }
 0x3bb   : > { %v4904_v30 = vpop.f32.mrf.mxu0  ;;  %v3674_v37 = vadd.f32 %v4915_v53, %v3560_v3 }
 0x3bc   : > { %v3653_v39 = vpop.f32.mrf.mxu1  ;;  %v3561_v47 = vadd.f32 %v4904_v30, %v3439_v14 }
 0x3bd   : > { %v3542_v20 = vpop.f32.mrf.mxu0  ;;  %v3672_v16 = vadd.f32 %v3653_v39, %v3558_v62 }
 0x3be   : > { %v4916_v60 = vpop.f32.mrf.mxu1  ;;  %v3559_v5 = vadd.f32 %v3542_v20, %v3437_v41 }
 0x3bf   : > { %v4923_v52 = vpop.f32.mrf.mxu0  ;;  %v3675_v38 = vadd.f32 %v4916_v60, %v3561_v47 }
 0x3c0   : > { %v3792_v35 = vadd.f32 %v4923_v52, %v3670_v63  ;;  %v3656_v6 = vpop.f32.mrf.mxu1  ;;  %v5040_v52 = vld [vmem:[%s6219_s11] sm:$0xff]  }
 0x3c1   : > { %v3759_v61 = vpop.f32.mrf.mxu0  ;;  %v3673_v17 = vadd.f32 %v3656_v6, %v3559_v5  ;;  %4955 = vmatprep.subr.bf16.mxu0 %v5040_v52 }
 0x3c2   : > { %v3790_v45 = vadd.f32 %v3759_v61, %v3668_v9  ;;  %v3807_v46 = vadd.f32 %v4405_v15, %v3792_v35  ;;  %4956 = vmatpush3.bf16.msra.mxu0 %v5040_v52 }
 0x3c3   : > { %v4924_v54 = vpop.f32.mrf.mxu0 }
 0x3c4   : > { %v3793_v44 = vadd.f32 %v4924_v54, %v3671_v13  ;;  %v3805_v11 = vadd.f32 %v4405_v15, %v3790_v45  ;;  %v3815_v19 = vmax.f32 %v3807_v46, 0.0  ;;  %v4413_v46 = vld [vmem:[%s6220_s12] ss:$0 sm:$0xff] }
 0x3c5   : > { %v3762_v48 = vpop.f32.mrf.mxu0 }
 0x3c6   : > { %v3808_v56 = vadd.f32 %v4405_v15, %v3793_v44  ;;  %v3791_v59 = vadd.f32 %v3762_v48, %v3669_v1  ;;  %v3813_v8 = vmax.f32 %v3805_v11, 0.0 }
 0x3c7   : > { %v4927_v43 = vpop.f32.mrf.mxu0 }
 0x3c8   : > { %v3806_v29 = vadd.f32 %v4405_v15, %v3791_v59  ;;  %v3816_v34 = vmax.f32 %v3808_v56, 0.0  ;;  %v3796_v33 = vadd.f32 %v4927_v43, %v3674_v37 }
 0x3c9   : > { %v3775_v0 = vpop.f32.mrf.mxu0 }
 0x3ca   : > { %v3814_v51 = vmax.f32 %v3806_v29, 0.0  ;;  %v3794_v24 = vadd.f32 %v3775_v0, %v3672_v16  ;;  %v3822_v36 = vpack.c.bf16 %v3816_v34, %v3815_v19  ;;  %v3811_v7 = vadd.f32 %v4405_v15, %v3796_v33 }
 0x3cb   : > { %v4928_v31 = vpop.f32.mrf.mxu0 }
 0x3cc   : > { %v3821_v57 = vpack.c.bf16 %v3814_v51, %v3813_v8  ;;  %v3797_v12 = vadd.f32 %v4928_v31, %v3675_v38  ;;  %v3809_v4 = vadd.f32 %v4405_v15, %v3794_v24  ;;  %v3819_v27 = vmax.f32 %v3811_v7, 0.0 }
 0x3cd   : > { %v3778_v30 = vpop.f32.mrf.mxu0 }
 0x3ce   : > { %v3812_v40 = vadd.f32 %v4405_v15, %v3797_v12  ;;  %v3795_v25 = vadd.f32 %v3778_v30, %v3673_v17  ;;  %4933 = vmatprep.mubr.msk.bf16.mxu1 %vm553_vm0, %v3821_v57  ;;  %v3817_v20 = vmax.f32 %v3809_v4, 0.0 }
 0x3cf   : > { %4934 = vmatmul.mubr.msk.bf16.vlgmr.msra.gmra.mxu1 %vm553_vm0, %v3822_v36 }
 0x3d0   : > { %v3810_v42 = vadd.f32 %v4405_v15, %v3795_v25  ;;  %v3820_v53 = vmax.f32 %v3812_v40, 0.0 }
 0x3d2   : > { %v3818_v26 = vmax.f32 %v3810_v42, 0.0  ;;  %v3824_v21 = vpack.c.bf16 %v3820_v53, %v3819_v27 }
 0x3d4   : > { %v3823_v55 = vpack.c.bf16 %v3818_v26, %v3817_v20 }
 0x3d6   : > { %4937 = vmatprep.mubr.msk.bf16.mxu1 %vm553_vm0, %v3823_v55 }
 0x3d7   : > { %4938 = vmatmul.mubr.msk.bf16.gmra.mxu1 %vm553_vm0, %v3824_v21 }
 0x48f   : > { %v4935_v18 = vpop.f32.mrf.mxu1 }
 0x490   : > { %v3903_v61 = vadd.f32 %v4935_v18, %v4406_v23 }
 0x491   : > { %v3894_v9 = vpop.f32.mrf.mxu1 }
 0x492   : > { %v3895_v63 = vadd.f32 %v4406_v23, %v3894_v9  ;;  %v3927_v54 = vmax.f32 %v3903_v61, 0.0 }
 0x493   : > { %v4936_v32 = vpop.f32.mrf.mxu1 }
 0x494   : > { %v3906_v39 = vadd.f32 %v4936_v32, %v4406_v23  ;;  %v3925_v10 = vmax.f32 %v3895_v63, 0.0 }
 0x495   : > { %v3897_v22 = vpop.f32.mrf.mxu1 }
 0x496   : > { %v3898_v13 = vadd.f32 %v4406_v23, %v3897_v22  ;;  %v3928_v45 = vmax.f32 %v3906_v39, 0.0 }
 0x497   : > { %v4939_v50 = vpop.f32.mrf.mxu1 }
 0x498   : > { %v3926_v35 = vmax.f32 %v3898_v13, 0.0  ;;  %v3934_v1 = vpack.c.bf16 %v3928_v45, %v3927_v54  ;;  %v3919_v28 = vadd.f32 %v4939_v50, %v4406_v23 }
 0x499   : > { %v3910_v58 = vpop.f32.mrf.mxu1 }
 0x49a   : > { %v3933_v14 = vpack.c.bf16 %v3926_v35, %v3925_v10  ;;  %v3911_v15 = vadd.f32 %v4406_v23, %v3910_v58  ;;  %v3931_v11 = vmax.f32 %v3919_v28, 0.0 }
 0x49b   : > { %v4940_v62 = vpop.f32.mrf.mxu1 }
 0x49c   : > { %v3922_v44 = vadd.f32 %v4940_v62, %v4406_v23  ;;  %4957 = vmatprep.mubr.bf16.mxu0 %v3933_v14  ;;  %v3929_v48 = vmax.f32 %v3911_v15, 0.0 }
 0x49d   : > { %v3913_v41 = vpop.f32.mrf.mxu1  ;;  %4958 = vmatmul.mubr.bf16.vlgmr.msra.gmra.mxu0 %v3934_v1 }
 0x49e   : > { %v3914_v3 = vadd.f32 %v4406_v23, %v3913_v41  ;;  %v3932_v60 = vmax.f32 %v3922_v44, 0.0 }
 0x4a0   : > { %v3930_v47 = vmax.f32 %v3914_v3, 0.0  ;;  %v3936_v59 = vpack.c.bf16 %v3932_v60, %v3931_v11 }
 0x4a2   : > { %v3935_v56 = vpack.c.bf16 %v3930_v47, %v3929_v48 }
 0x4a4   : > { %4961 = vmatprep.mubr.bf16.mxu0 %v3935_v56 }
 0x4a5   : > { %4962 = vmatmul.mubr.bf16.gmra.mxu0 %v3936_v59 }
 0x55d   : > { %v4959_v43 = vpop.f32.mrf.mxu0 }
 0x55e   : > { %v4051_v16 = vadd.f32 %v4959_v43, %v4413_v46 }
 0x55f   : > { %v4042_v5 = vpop.f32.mrf.mxu0 }
 0x560   : > { %4076 = vst.msk [vmem:[%s442_s29 + $0x10] sm:$0xff] %vm4073_vm1, %v4051_v16  ;;  %v4043_v29 = vadd.f32 %v4413_v46, %v4042_v5 }
 0x561   : > { %v4960_v37 = vpop.f32.mrf.mxu0 }
 0x562   : > { %4074 = vst.msk [vmem:[%s442_s29] sm:$0xff] %vm4073_vm1, %v4043_v29  ;;  %v4054_v6 = vadd.f32 %v4960_v37, %v4413_v46 }
 0x563   : > { %v4045_v34 = vpop.f32.mrf.mxu0 }
 0x564   : > { %4077 = vst.msk [vmem:[%s442_s29 + $0x18] sm:$0xff] %vm4073_vm1, %v4054_v6  ;;  %v4046_v0 = vadd.f32 %v4413_v46, %v4045_v34 }
 0x565   : > { %v4963_v38 = vpop.f32.mrf.mxu0 }
 0x566   : > { %4075 = vst.msk [vmem:[%s442_s29 + $0x8] sm:$0xff] %vm4073_vm1, %v4046_v0  ;;  %v4067_v8 = vadd.f32 %v4963_v38, %v4413_v46 }
 0x567   : > { %v4058_v51 = vpop.f32.mrf.mxu0 }
 0x568   : > { %4080 = vst.msk [vmem:[%s442_s29 + $0x30] sm:$0xff] %vm4073_vm1, %v4067_v8  ;;  %v4059_v24 = vadd.f32 %v4413_v46, %v4058_v51 }
 0x569   : > { %v4964_v19 = vpop.f32.mrf.mxu0 }
 0x56a   : > { %4078 = vst.msk [vmem:[%s442_s29 + $0x20] sm:$0xff] %vm4073_vm1, %v4059_v24  ;;  %v4070_v33 = vadd.f32 %v4964_v19, %v4413_v46 }
 0x56b   : > { %v4061_v31 = vpop.f32.mrf.mxu0 }
 0x56c   : > { %4081 = vst.msk [vmem:[%s442_s29 + $0x38] sm:$0xff] %vm4073_vm1, %v4070_v33  ;;  %v4062_v17 = vadd.f32 %v4413_v46, %v4061_v31 }
 0x56e   : > { %4079 = vst.msk [vmem:[%s442_s29 + $0x28] sm:$0xff] %vm4073_vm1, %v4062_v17 }
 0x56f PF: > { %s23_s25 = sadd.s32 1, %s5047_s25  }
 0x570   : > { %p20_p5 = scmp.ge.s32.totalorder %s23_s25, 4  }
 0x572   :  { %22 = sbr.rel (!%p20_p5) target bundleno = 1 (0x1), region = 126 }

</bundles_post_ra>
